<compile_context>
chip_gen: v5e
topology: v5e:2x2
jax: 0.10.0
libtpu: 0.0.40
codegen_flags: <defaults>
</compile_context>

<pallas_src>
import functools

import jax
import jax.numpy as jnp
from jax import lax
from jax.experimental import pallas as pl
from jax.experimental.pallas import tpu as pltpu

EPS = 1e-5


def _make_kernel(H, W, C, Cmid, PAD):
    HW = H * W
    PADLEN = PAD + HW + PAD
    assert W + 1 <= PAD

    def kernel(x_ref, w1_ref, w2_ref, pc_ref, se_ref, o_ref, pad, patch):
        f32 = jnp.float32
        bf16 = jnp.bfloat16

        # Zero only the halo lanes (interior is fully rewritten below).  Done
        # every grid step so it stays correct when the "parallel" batch axis is
        # split across TensorCores.  Cost: 2 stores of (C, PAD) bf16 -- tiny.
        pad[:, 0:PAD] = jnp.zeros((C, PAD), bf16)
        pad[:, PAD + HW:PADLEN] = jnp.zeros((C, PAD), bf16)

        # packed per-channel constants (columns of pc_ref), each (C, 1), f32
        s0 = pc_ref[:, 0:1]             # input-BN scale
        b0 = pc_ref[:, 1:2]             # input-BN shift
        b1 = pc_ref[:, 2:3]             # BN-after-conv1 shift (scale folded in w1)
        ap = pc_ref[:, 3:4]             # PReLU per-channel slope
        b2 = pc_ref[:, 4:5]             # BN-after-conv2 shift (scale folded in w2)
        se1 = se_ref[:, 0:Cmid]         # (C, Cmid)  fc1 weight (transposed)
        se2 = se_ref[:, Cmid:2 * Cmid]  # (C, Cmid)  fc2 weight

        # Hoisted column-validity masks for the +/-1 horizontal taps (they mask
        # the row-wrap columns of the flattened layout), materialized once as
        # bf16 multiplicands so no broadcast is re-emitted per tap.
        j = lax.broadcasted_iota(jnp.int32, (C, HW), 1) % W
        mask_m1 = (j >= 1).astype(bf16)        # ox == -1 : column 0 invalid
        mask_p1 = (j <= W - 2).astype(bf16)    # ox == +1 : column W-1 invalid

        def im2col():
            # Write the 9 lane-shifted (and masked) views of the padded image
            # into sublane blocks of the (9*C, HW) patch scratch.
            t = 0
            for oy in (-1, 0, 1):
                for ox in (-1, 0, 1):
                    start = PAD + oy * W + ox          # static lane offset
                    v = pad[:, start:start + HW]
                    if ox == -1:
                        v = v * mask_m1
                    elif ox == 1:
                        v = v * mask_p1
                    patch[t * C:(t + 1) * C, :] = v
                    t += 1

        x = x_ref[0].astype(f32)                        # (C, HW)

        # input BN (eval mode, folded) -> bf16 interior of the padded scratch
        pad[:, PAD:PAD + HW] = (x * s0 + b0).astype(bf16)
        im2col()
        # conv1 (+ folded BN scale): one MXU matmul, K = 9*C, f32 accumulation
        y = jnp.dot(w1_ref[...], patch[...], preferred_element_type=f32) + b1
        y = jnp.where(y > 0, y, ap * y)                 # PReLU

        pad[:, PAD:PAD + HW] = y.astype(bf16)
        im2col()
        y = jnp.dot(w2_ref[...], patch[...], preferred_element_type=f32) + b2

        # SE: global avg-pool -> fc1 -> ReLU -> fc2 -> sigmoid -> gate (f32)
        pooled = jnp.mean(y, axis=1, keepdims=True)                          # (C, 1)
        z = jnp.maximum(jnp.sum(se1 * pooled, axis=0, keepdims=True), 0.0)   # (1, Cmid)
        gate_pre = jnp.sum(se2 * z, axis=1, keepdims=True)                   # (C, 1)
        gate = 1.0 / (1.0 + jnp.exp(-gate_pre))

        o_ref[0] = (y * gate + x).astype(o_ref.dtype)   # SE scale + identity

    return kernel, PADLEN


def bottleneck_ir_se(x_nchw, params):
    """Forward of BottleneckIRSE (identity shortcut, eval-mode BN) via Pallas."""
    (bn0_g, bn0_b, bn0_rm, bn0_rv,
     w1, bn1_g, bn1_b, bn1_rm, bn1_rv,
     prelu_a,
     w2, bn2_g, bn2_b, bn2_rm, bn2_rv,
     se_fc1_w, se_fc2_w) = params

    N, C, H, W = x_nchw.shape
    Cout = w1.shape[0]
    Cmid = se_fc1_w.shape[0]
    HW = H * W
    assert C == Cout, "identity shortcut requires in_channels == out_channels"
    PAD = 128                                    # lane-aligned halo; >= W + 1

    # fold eval-mode BN into per-channel scale/shift
    s0 = bn0_g / jnp.sqrt(bn0_rv + EPS)
    b0 = bn0_b - bn0_rm * s0
    s1 = bn1_g / jnp.sqrt(bn1_rv + EPS)
    b1 = bn1_b - bn1_rm * s1
    s2 = bn2_g / jnp.sqrt(bn2_rv + EPS)
    b2 = bn2_b - bn2_rm * s2

    # fold post-conv BN scales into conv weights and lay them out for im2col:
    # OIHW -> (O, ky, kx, I) -> (O, 9*I); patch row index = t*C + i, t = ky*3+kx.
    # bf16 operands; accumulation stays f32 inside the kernel.
    w1f = jnp.transpose(w1 * s1[:, None, None, None],
                        (0, 2, 3, 1)).reshape(Cout, 9 * C).astype(jnp.bfloat16)
    w2f = jnp.transpose(w2 * s2[:, None, None, None],
                        (0, 2, 3, 1)).reshape(Cout, 9 * Cout).astype(jnp.bfloat16)

    pc = jnp.stack([s0, b0, b1, prelu_a, b2], axis=1).astype(jnp.float32)     # (C, 5)
    se_w = jnp.concatenate([se_fc1_w.reshape(Cmid, Cout).T,
                            se_fc2_w.reshape(Cout, Cmid)], axis=1).astype(jnp.float32)

    kernel, padlen = _make_kernel(H, W, C, Cmid, PAD)

    out = pl.pallas_call(
        kernel,
        out_shape=jax.ShapeDtypeStruct((N, Cout, HW), x_nchw.dtype),
        grid=(N,),
        in_specs=[
            pl.BlockSpec((1, C, HW), lambda n: (n, 0, 0)),       # x (pipelined)
            pl.BlockSpec((Cout, 9 * C), lambda n: (0, 0)),       # conv1 weights
            pl.BlockSpec((Cout, 9 * Cout), lambda n: (0, 0)),    # conv2 weights
            pl.BlockSpec((C, 5), lambda n: (0, 0)),              # per-channel consts
            pl.BlockSpec((Cout, 2 * Cmid), lambda n: (0, 0)),    # SE weights
        ],
        out_specs=pl.BlockSpec((1, Cout, HW), lambda n: (n, 0, 0)),
        scratch_shapes=[
            pltpu.VMEM((C, padlen), jnp.bfloat16),       # zero-padded image (bf16)
            pltpu.VMEM((9 * C, HW), jnp.bfloat16),       # im2col patch (bf16)
        ],
        compiler_params=pltpu.CompilerParams(
            dimension_semantics=("parallel",),           # batch across TCs (v7x)
            vmem_limit_bytes=32 * 1024 * 1024),          # fits v7x's 64 MiB VMEM
        input_output_aliases={0: 0},                     # out block aliases x block
    )(x_nchw.reshape(N, C, HW), w1f, w2f, pc, se_w)

    return out.reshape(N, Cout, H, W)


def reference(x_nchw, params):
    """Pure-JAX f32 reference (same eval-mode semantics, lax.conv, HIGHEST)."""
    (bn0_g, bn0_b, bn0_rm, bn0_rv,
     w1, bn1_g, bn1_b, bn1_rm, bn1_rv,
     prelu_a,
     w2, bn2_g, bn2_b, bn2_rm, bn2_rv,
     se_fc1_w, se_fc2_w) = params

    def bn(x, g, b, rm, rv):
        s = g / jnp.sqrt(rv + EPS)
        return (x - rm[None, :, None, None]) * s[None, :, None, None] \
            + b[None, :, None, None]

    dn = ('NCHW', 'OIHW', 'NCHW')
    conv = functools.partial(lax.conv_general_dilated, dimension_numbers=dn,
                             precision=lax.Precision.HIGHEST)

    y = bn(x_nchw, bn0_g, bn0_b, bn0_rm, bn0_rv)
    y = conv(y, w1, (1, 1), 'SAME')
    y = bn(y, bn1_g, bn1_b, bn1_rm, bn1_rv)
    y = jnp.where(y > 0, y, prelu_a[None, :, None, None] * y)
    y = conv(y, w2, (1, 1), 'SAME')
    y = bn(y, bn2_g, bn2_b, bn2_rm, bn2_rv)
    pooled = jnp.mean(y, axis=(2, 3), keepdims=True)
    z = jnp.maximum(conv(pooled, se_fc1_w, (1, 1), 'VALID'), 0.0)
    gate = 1.0 / (1.0 + jnp.exp(-conv(z, se_fc2_w, (1, 1), 'VALID')))
    return y * gate + x_nchw


if __name__ == "__main__":
    key = jax.random.PRNGKey(0)
    # SEModule(channels, reduction=16) needs channels >= 16, so C = 16 (not 4).
    N, C, H, W = 2, 16, 16, 16
    Cmid = C // 16

    ks = jax.random.split(key, 18)
    x = jax.random.normal(ks[0], (N, C, H, W), jnp.float32)

    bn0_g = jax.random.uniform(ks[1], (C,), jnp.float32, 0.5, 1.5)
    bn0_b = 0.1 * jax.random.normal(ks[2], (C,), jnp.float32)
    bn0_rm = 0.1 * jax.random.normal(ks[3], (C,), jnp.float32)
    bn0_rv = jax.random.uniform(ks[4], (C,), jnp.float32, 0.5, 1.5)

    w1 = 0.1 * jax.random.normal(ks[5], (C, C, 3, 3), jnp.float32)
    bn1_g = jax.random.uniform(ks[6], (C,), jnp.float32, 0.5, 1.5)
    bn1_b = 0.1 * jax.random.normal(ks[7], (C,), jnp.float32)
    bn1_rm = 0.1 * jax.random.normal(ks[8], (C,), jnp.float32)
    bn1_rv = jax.random.uniform(ks[9], (C,), jnp.float32, 0.5, 1.5)

    prelu_a = 0.25 + 0.05 * jax.random.normal(ks[10], (C,), jnp.float32)

    w2 = 0.1 * jax.random.normal(ks[11], (C, C, 3, 3), jnp.float32)
    bn2_g = jax.random.uniform(ks[12], (C,), jnp.float32, 0.5, 1.5)
    bn2_b = 0.1 * jax.random.normal(ks[13], (C,), jnp.float32)
    bn2_rm = 0.1 * jax.random.normal(ks[14], (C,), jnp.float32)
    bn2_rv = jax.random.uniform(ks[15], (C,), jnp.float32, 0.5, 1.5)

    se_fc1_w = 0.1 * jax.random.normal(ks[16], (Cmid, C, 1, 1), jnp.float32)
    se_fc2_w = 0.1 * jax.random.normal(ks[17], (C, Cmid, 1, 1), jnp.float32)

    params = (bn0_g, bn0_b, bn0_rm, bn0_rv,
              w1, bn1_g, bn1_b, bn1_rm, bn1_rv,
              prelu_a,
              w2, bn2_g, bn2_b, bn2_rm, bn2_rv,
              se_fc1_w, se_fc2_w)

    out = jax.block_until_ready(bottleneck_ir_se(x, params))
    ref = jax.block_until_ready(reference(x, params))

    assert out.shape == (N, C, H, W), out.shape
    err = jnp.abs(out - ref)
    max_err = float(jnp.max(err))
    mean_err = float(jnp.mean(err))
    # Kernel uses bf16 matmul operands (f32 accumulation) while the reference is
    # all-f32 HIGHEST precision, so the tolerance is wider than 1e-3; the mean
    # check still catches structural bugs (bad taps / masks / halos).
    assert jnp.allclose(out, ref, atol=5e-2, rtol=2e-2), (max_err, mean_err)
    assert mean_err < 1e-2, (max_err, mean_err)
    print("KERNEL_OK")
</pallas_src>

<mosaic_0001>
module attributes {stable_mosaic.version = 11 : i64} {
  func.func @kernel(%arg0: i32, %arg1: memref<1x16x256xf32, #tpu.memory_space<vmem>>, %arg2: memref<16x144xbf16, #tpu.memory_space<vmem>>, %arg3: memref<16x144xbf16, #tpu.memory_space<vmem>>, %arg4: memref<16x5xf32, #tpu.memory_space<vmem>>, %arg5: memref<16x2xf32, #tpu.memory_space<vmem>>, %arg6: memref<1x16x256xf32, #tpu.memory_space<vmem>>, %arg7: memref<16x512xbf16, #tpu.memory_space<vmem>>, %arg8: memref<144x256xbf16, #tpu.memory_space<vmem>>) attributes {dimension_semantics = [#tpu.dimension_semantics<parallel>], iteration_bounds = array<i64: 2>, scalar_prefetch = 0 : i64, scratch_operands = 2 : i64, tpu.core_type = #tpu.core_type<tc>, window_params = [{transform_indices = @transform_0, window_bounds = array<i64: 1, 16, 256>}, {pipeline_mode = #tpu.pipeline_mode<synchronous>, transform_indices = @transform_1, window_bounds = array<i64: 16, 144>}, {pipeline_mode = #tpu.pipeline_mode<synchronous>, transform_indices = @transform_2, window_bounds = array<i64: 16, 144>}, {pipeline_mode = #tpu.pipeline_mode<synchronous>, transform_indices = @transform_3, window_bounds = array<i64: 16, 5>}, {pipeline_mode = #tpu.pipeline_mode<synchronous>, transform_indices = @transform_4, window_bounds = array<i64: 16, 2>}, {transform_indices = @transform_5, window_bounds = array<i64: 1, 16, 256>}]} {
    %cst = arith.constant 0.000000e+00 : bf16
    %0 = vector.broadcast %cst : bf16 to vector<16x128xbf16>
    %c0 = arith.constant 0 : index
    %c0_0 = arith.constant 0 : index
    %1 = vector.load %arg7[%c0, %c0_0] : memref<16x512xbf16, #tpu.memory_space<vmem>>, vector<16x128xbf16>
    tpu.vector_store %arg7[%c0, %c0_0], %0 {strides = array<i32>} : memref<16x512xbf16, #tpu.memory_space<vmem>>, vector<16x128xbf16>,
    %cst_1 = arith.constant 0.000000e+00 : bf16
    %2 = vector.broadcast %cst_1 : bf16 to vector<16x128xbf16>
    %c0_2 = arith.constant 0 : index
    %c384 = arith.constant 384 : index
    %3 = vector.load %arg7[%c0_2, %c384] : memref<16x512xbf16, #tpu.memory_space<vmem>>, vector<16x128xbf16>
    tpu.vector_store %arg7[%c0_2, %c384], %2 {strides = array<i32>} : memref<16x512xbf16, #tpu.memory_space<vmem>>, vector<16x128xbf16>,
    %c0_3 = arith.constant 0 : index
    %c0_4 = arith.constant 0 : index
    %4 = vector.load %arg4[%c0_3, %c0_4] : memref<16x5xf32, #tpu.memory_space<vmem>>, vector<16x1xf32>
    %c0_5 = arith.constant 0 : index
    %c1 = arith.constant 1 : index
    %5 = vector.load %arg4[%c0_5, %c1] : memref<16x5xf32, #tpu.memory_space<vmem>>, vector<16x1xf32>
    %c0_6 = arith.constant 0 : index
    %c2 = arith.constant 2 : index
    %6 = vector.load %arg4[%c0_6, %c2] : memref<16x5xf32, #tpu.memory_space<vmem>>, vector<16x1xf32>
    %c0_7 = arith.constant 0 : index
    %c3 = arith.constant 3 : index
    %7 = vector.load %arg4[%c0_7, %c3] : memref<16x5xf32, #tpu.memory_space<vmem>>, vector<16x1xf32>
    %c0_8 = arith.constant 0 : index
    %c4 = arith.constant 4 : index
    %8 = vector.load %arg4[%c0_8, %c4] : memref<16x5xf32, #tpu.memory_space<vmem>>, vector<16x1xf32>
    %c0_9 = arith.constant 0 : index
    %c0_10 = arith.constant 0 : index
    %9 = vector.load %arg5[%c0_9, %c0_10] : memref<16x2xf32, #tpu.memory_space<vmem>>, vector<16x1xf32>
    %c0_11 = arith.constant 0 : index
    %c1_12 = arith.constant 1 : index
    %10 = vector.load %arg5[%c0_11, %c1_12] : memref<16x2xf32, #tpu.memory_space<vmem>>, vector<16x1xf32>
    %11 = tpu.iota {dimensions = array<i32: 1>} : vector<16x256xi32>
    %c16_i32 = arith.constant 16 : i32
    %c0_i32 = arith.constant 0 : i32
    %12 = arith.cmpi eq, %c16_i32, %c0_i32 : i32
    %c1_i32 = arith.constant 1 : i32
    %13 = arith.select %12, %c1_i32, %c16_i32 : i32
    %14 = vector.broadcast %13 : i32 to vector<16x256xi32>
    %15 = arith.remsi %11, %14 : vector<16x256xi32>
    %c0_i32_13 = arith.constant 0 : i32
    %16 = vector.broadcast %c0_i32_13 : i32 to vector<16x256xi32>
    %17 = arith.cmpi ne, %15, %16 : vector<16x256xi32>
    %c0_i32_14 = arith.constant 0 : i32
    %18 = vector.broadcast %c0_i32_14 : i32 to vector<16x256xi32>
    %19 = arith.cmpi slt, %15, %18 : vector<16x256xi32>
    %c0_i32_15 = arith.constant 0 : i32
    %20 = arith.cmpi slt, %13, %c0_i32_15 : i32
    %21 = vector.broadcast %20 : i1 to vector<16x256xi1>
    %22 = vector.broadcast %21 : vector<16x256xi1> to vector<16x256xi1>
    %23 = arith.xori %19, %22 : vector<16x256xi1>
    %24 = arith.andi %23, %17 : vector<16x256xi1>
    %25 = vector.broadcast %13 : i32 to vector<16x256xi32>
    %26 = arith.addi %15, %25 : vector<16x256xi32>
    %27 = arith.select %24, %26, %15 : vector<16x256xi1>, vector<16x256xi32>
    %c1_i32_16 = arith.constant 1 : i32
    %28 = vector.broadcast %c1_i32_16 : i32 to vector<16x256xi32>
    %29 = arith.cmpi sge, %27, %28 : vector<16x256xi32>
    %30 = arith.extui %29 : vector<16x256xi1> to vector<16x256xi32>
    %31 = arith.sitofp %30 : vector<16x256xi32> to vector<16x256xf32>
    %32 = arith.truncf %31 : vector<16x256xf32> to vector<16x256xbf16>
    %c14_i32 = arith.constant 14 : i32
    %33 = vector.broadcast %c14_i32 : i32 to vector<16x256xi32>
    %34 = arith.cmpi sle, %27, %33 : vector<16x256xi32>
    %35 = arith.extui %34 : vector<16x256xi1> to vector<16x256xi32>
    %36 = arith.sitofp %35 : vector<16x256xi32> to vector<16x256xf32>
    %37 = arith.truncf %36 : vector<16x256xf32> to vector<16x256xbf16>
    %c0_17 = arith.constant 0 : index
    %c0_18 = arith.constant 0 : index
    %c0_19 = arith.constant 0 : index
    %38 = vector.load %arg1[%c0_17, %c0_18, %c0_19] : memref<1x16x256xf32, #tpu.memory_space<vmem>>, vector<1x16x256xf32>
    %39 = vector.shape_cast %38 : vector<1x16x256xf32> to vector<16x256xf32>
    %40 = vector.broadcast %4 : vector<16x1xf32> to vector<16x256xf32>
    %41 = arith.mulf %39, %40 : vector<16x256xf32>
    %42 = vector.broadcast %5 : vector<16x1xf32> to vector<16x256xf32>
    %43 = arith.addf %41, %42 : vector<16x256xf32>
    %44 = arith.truncf %43 : vector<16x256xf32> to vector<16x256xbf16>
    %c0_20 = arith.constant 0 : index
    %c128 = arith.constant 128 : index
    %45 = vector.load %arg7[%c0_20, %c128] : memref<16x512xbf16, #tpu.memory_space<vmem>>, vector<16x256xbf16>
    tpu.vector_store %arg7[%c0_20, %c128], %44 {strides = array<i32>} : memref<16x512xbf16, #tpu.memory_space<vmem>>, vector<16x256xbf16>,
    %c0_21 = arith.constant 0 : index
    %c111 = arith.constant 111 : index
    %46 = vector.load %arg7[%c0_21, %c111] : memref<16x512xbf16, #tpu.memory_space<vmem>>, vector<16x256xbf16>
    %47 = arith.mulf %46, %32 : vector<16x256xbf16>
    %c0_22 = arith.constant 0 : index
    %c0_23 = arith.constant 0 : index
    %48 = vector.load %arg8[%c0_22, %c0_23] : memref<144x256xbf16, #tpu.memory_space<vmem>>, vector<16x256xbf16>
    tpu.vector_store %arg8[%c0_22, %c0_23], %47 {strides = array<i32>} : memref<144x256xbf16, #tpu.memory_space<vmem>>, vector<16x256xbf16>,
    %c0_24 = arith.constant 0 : index
    %c112 = arith.constant 112 : index
    %49 = vector.load %arg7[%c0_24, %c112] : memref<16x512xbf16, #tpu.memory_space<vmem>>, vector<16x256xbf16>
    %c16 = arith.constant 16 : index
    %c0_25 = arith.constant 0 : index
    %50 = vector.load %arg8[%c16, %c0_25] : memref<144x256xbf16, #tpu.memory_space<vmem>>, vector<16x256xbf16>
    tpu.vector_store %arg8[%c16, %c0_25], %49 {strides = array<i32>} : memref<144x256xbf16, #tpu.memory_space<vmem>>, vector<16x256xbf16>,
    %c0_26 = arith.constant 0 : index
    %c113 = arith.constant 113 : index
    %51 = vector.load %arg7[%c0_26, %c113] : memref<16x512xbf16, #tpu.memory_space<vmem>>, vector<16x256xbf16>
    %52 = arith.mulf %51, %37 : vector<16x256xbf16>
    %c32 = arith.constant 32 : index
    %c0_27 = arith.constant 0 : index
    %53 = vector.load %arg8[%c32, %c0_27] : memref<144x256xbf16, #tpu.memory_space<vmem>>, vector<16x256xbf16>
    tpu.vector_store %arg8[%c32, %c0_27], %52 {strides = array<i32>} : memref<144x256xbf16, #tpu.memory_space<vmem>>, vector<16x256xbf16>,
    %c0_28 = arith.constant 0 : index
    %c127 = arith.constant 127 : index
    %54 = vector.load %arg7[%c0_28, %c127] : memref<16x512xbf16, #tpu.memory_space<vmem>>, vector<16x256xbf16>
    %55 = arith.mulf %54, %32 : vector<16x256xbf16>
    %c48 = arith.constant 48 : index
    %c0_29 = arith.constant 0 : index
    %56 = vector.load %arg8[%c48, %c0_29] : memref<144x256xbf16, #tpu.memory_space<vmem>>, vector<16x256xbf16>
    tpu.vector_store %arg8[%c48, %c0_29], %55 {strides = array<i32>} : memref<144x256xbf16, #tpu.memory_space<vmem>>, vector<16x256xbf16>,
    %c0_30 = arith.constant 0 : index
    %c128_31 = arith.constant 128 : index
    %57 = vector.load %arg7[%c0_30, %c128_31] : memref<16x512xbf16, #tpu.memory_space<vmem>>, vector<16x256xbf16>
    %c64 = arith.constant 64 : index
    %c0_32 = arith.constant 0 : index
    %58 = vector.load %arg8[%c64, %c0_32] : memref<144x256xbf16, #tpu.memory_space<vmem>>, vector<16x256xbf16>
    tpu.vector_store %arg8[%c64, %c0_32], %57 {strides = array<i32>} : memref<144x256xbf16, #tpu.memory_space<vmem>>, vector<16x256xbf16>,
    %c0_33 = arith.constant 0 : index
    %c129 = arith.constant 129 : index
    %59 = vector.load %arg7[%c0_33, %c129] : memref<16x512xbf16, #tpu.memory_space<vmem>>, vector<16x256xbf16>
    %60 = arith.mulf %59, %37 : vector<16x256xbf16>
    %c80 = arith.constant 80 : index
    %c0_34 = arith.constant 0 : index
    %61 = vector.load %arg8[%c80, %c0_34] : memref<144x256xbf16, #tpu.memory_space<vmem>>, vector<16x256xbf16>
    tpu.vector_store %arg8[%c80, %c0_34], %60 {strides = array<i32>} : memref<144x256xbf16, #tpu.memory_space<vmem>>, vector<16x256xbf16>,
    %c0_35 = arith.constant 0 : index
    %c143 = arith.constant 143 : index
    %62 = vector.load %arg7[%c0_35, %c143] : memref<16x512xbf16, #tpu.memory_space<vmem>>, vector<16x256xbf16>
    %63 = arith.mulf %62, %32 : vector<16x256xbf16>
    %c96 = arith.constant 96 : index
    %c0_36 = arith.constant 0 : index
    %64 = vector.load %arg8[%c96, %c0_36] : memref<144x256xbf16, #tpu.memory_space<vmem>>, vector<16x256xbf16>
    tpu.vector_store %arg8[%c96, %c0_36], %63 {strides = array<i32>} : memref<144x256xbf16, #tpu.memory_space<vmem>>, vector<16x256xbf16>,
    %c0_37 = arith.constant 0 : index
    %c144 = arith.constant 144 : index
    %65 = vector.load %arg7[%c0_37, %c144] : memref<16x512xbf16, #tpu.memory_space<vmem>>, vector<16x256xbf16>
    %c112_38 = arith.constant 112 : index
    %c0_39 = arith.constant 0 : index
    %66 = vector.load %arg8[%c112_38, %c0_39] : memref<144x256xbf16, #tpu.memory_space<vmem>>, vector<16x256xbf16>
    tpu.vector_store %arg8[%c112_38, %c0_39], %65 {strides = array<i32>} : memref<144x256xbf16, #tpu.memory_space<vmem>>, vector<16x256xbf16>,
    %c0_40 = arith.constant 0 : index
    %c145 = arith.constant 145 : index
    %67 = vector.load %arg7[%c0_40, %c145] : memref<16x512xbf16, #tpu.memory_space<vmem>>, vector<16x256xbf16>
    %68 = arith.mulf %67, %37 : vector<16x256xbf16>
    %c128_41 = arith.constant 128 : index
    %c0_42 = arith.constant 0 : index
    %69 = vector.load %arg8[%c128_41, %c0_42] : memref<144x256xbf16, #tpu.memory_space<vmem>>, vector<16x256xbf16>
    tpu.vector_store %arg8[%c128_41, %c0_42], %68 {strides = array<i32>} : memref<144x256xbf16, #tpu.memory_space<vmem>>, vector<16x256xbf16>,
    %c0_43 = arith.constant 0 : index
    %c0_44 = arith.constant 0 : index
    %70 = vector.load %arg2[%c0_43, %c0_44] : memref<16x144xbf16, #tpu.memory_space<vmem>>, vector<16x144xbf16>
    %c0_45 = arith.constant 0 : index
    %c0_46 = arith.constant 0 : index
    %71 = vector.load %arg8[%c0_45, %c0_46] : memref<144x256xbf16, #tpu.memory_space<vmem>>, vector<144x256xbf16>
    %cst_47 = arith.constant dense<0.000000e+00> : vector<16x256xf32>
    %72 = tpu.matmul %70, %71, %cst_47 {dimension_numbers = #tpu.dot_dimension_numbers<[1], [0], [0], [1], [0, 0, 1, 1], [], []>} : vector<16x144xbf16>, vector<144x256xbf16>, vector<16x256xf32> -> vector<16x256xf32>
    %73 = vector.broadcast %6 : vector<16x1xf32> to vector<16x256xf32>
    %74 = arith.addf %72, %73 : vector<16x256xf32>
    %cst_48 = arith.constant 0.000000e+00 : f32
    %75 = vector.broadcast %cst_48 : f32 to vector<16x256xf32>
    %76 = arith.cmpf ogt, %74, %75 : vector<16x256xf32>
    %77 = vector.broadcast %7 : vector<16x1xf32> to vector<16x256xf32>
    %78 = arith.mulf %77, %74 : vector<16x256xf32>
    %79 = arith.select %76, %74, %78 : vector<16x256xi1>, vector<16x256xf32>
    %80 = arith.truncf %79 : vector<16x256xf32> to vector<16x256xbf16>
    %c0_49 = arith.constant 0 : index
    %c128_50 = arith.constant 128 : index
    %81 = vector.load %arg7[%c0_49, %c128_50] : memref<16x512xbf16, #tpu.memory_space<vmem>>, vector<16x256xbf16>
    tpu.vector_store %arg7[%c0_49, %c128_50], %80 {strides = array<i32>} : memref<16x512xbf16, #tpu.memory_space<vmem>>, vector<16x256xbf16>,
    %c0_51 = arith.constant 0 : index
    %c111_52 = arith.constant 111 : index
    %82 = vector.load %arg7[%c0_51, %c111_52] : memref<16x512xbf16, #tpu.memory_space<vmem>>, vector<16x256xbf16>
    %83 = arith.mulf %82, %32 : vector<16x256xbf16>
    %c0_53 = arith.constant 0 : index
    %c0_54 = arith.constant 0 : index
    %84 = vector.load %arg8[%c0_53, %c0_54] : memref<144x256xbf16, #tpu.memory_space<vmem>>, vector<16x256xbf16>
    tpu.vector_store %arg8[%c0_53, %c0_54], %83 {strides = array<i32>} : memref<144x256xbf16, #tpu.memory_space<vmem>>, vector<16x256xbf16>,
    %c0_55 = arith.constant 0 : index
    %c112_56 = arith.constant 112 : index
    %85 = vector.load %arg7[%c0_55, %c112_56] : memref<16x512xbf16, #tpu.memory_space<vmem>>, vector<16x256xbf16>
    %c16_57 = arith.constant 16 : index
    %c0_58 = arith.constant 0 : index
    %86 = vector.load %arg8[%c16_57, %c0_58] : memref<144x256xbf16, #tpu.memory_space<vmem>>, vector<16x256xbf16>
    tpu.vector_store %arg8[%c16_57, %c0_58], %85 {strides = array<i32>} : memref<144x256xbf16, #tpu.memory_space<vmem>>, vector<16x256xbf16>,
    %c0_59 = arith.constant 0 : index
    %c113_60 = arith.constant 113 : index
    %87 = vector.load %arg7[%c0_59, %c113_60] : memref<16x512xbf16, #tpu.memory_space<vmem>>, vector<16x256xbf16>
    %88 = arith.mulf %87, %37 : vector<16x256xbf16>
    %c32_61 = arith.constant 32 : index
    %c0_62 = arith.constant 0 : index
    %89 = vector.load %arg8[%c32_61, %c0_62] : memref<144x256xbf16, #tpu.memory_space<vmem>>, vector<16x256xbf16>
    tpu.vector_store %arg8[%c32_61, %c0_62], %88 {strides = array<i32>} : memref<144x256xbf16, #tpu.memory_space<vmem>>, vector<16x256xbf16>,
    %c0_63 = arith.constant 0 : index
    %c127_64 = arith.constant 127 : index
    %90 = vector.load %arg7[%c0_63, %c127_64] : memref<16x512xbf16, #tpu.memory_space<vmem>>, vector<16x256xbf16>
    %91 = arith.mulf %90, %32 : vector<16x256xbf16>
    %c48_65 = arith.constant 48 : index
    %c0_66 = arith.constant 0 : index
    %92 = vector.load %arg8[%c48_65, %c0_66] : memref<144x256xbf16, #tpu.memory_space<vmem>>, vector<16x256xbf16>
    tpu.vector_store %arg8[%c48_65, %c0_66], %91 {strides = array<i32>} : memref<144x256xbf16, #tpu.memory_space<vmem>>, vector<16x256xbf16>,
    %c0_67 = arith.constant 0 : index
    %c128_68 = arith.constant 128 : index
    %93 = vector.load %arg7[%c0_67, %c128_68] : memref<16x512xbf16, #tpu.memory_space<vmem>>, vector<16x256xbf16>
    %c64_69 = arith.constant 64 : index
    %c0_70 = arith.constant 0 : index
    %94 = vector.load %arg8[%c64_69, %c0_70] : memref<144x256xbf16, #tpu.memory_space<vmem>>, vector<16x256xbf16>
    tpu.vector_store %arg8[%c64_69, %c0_70], %93 {strides = array<i32>} : memref<144x256xbf16, #tpu.memory_space<vmem>>, vector<16x256xbf16>,
    %c0_71 = arith.constant 0 : index
    %c129_72 = arith.constant 129 : index
    %95 = vector.load %arg7[%c0_71, %c129_72] : memref<16x512xbf16, #tpu.memory_space<vmem>>, vector<16x256xbf16>
    %96 = arith.mulf %95, %37 : vector<16x256xbf16>
    %c80_73 = arith.constant 80 : index
    %c0_74 = arith.constant 0 : index
    %97 = vector.load %arg8[%c80_73, %c0_74] : memref<144x256xbf16, #tpu.memory_space<vmem>>, vector<16x256xbf16>
    tpu.vector_store %arg8[%c80_73, %c0_74], %96 {strides = array<i32>} : memref<144x256xbf16, #tpu.memory_space<vmem>>, vector<16x256xbf16>,
    %c0_75 = arith.constant 0 : index
    %c143_76 = arith.constant 143 : index
    %98 = vector.load %arg7[%c0_75, %c143_76] : memref<16x512xbf16, #tpu.memory_space<vmem>>, vector<16x256xbf16>
    %99 = arith.mulf %98, %32 : vector<16x256xbf16>
    %c96_77 = arith.constant 96 : index
    %c0_78 = arith.constant 0 : index
    %100 = vector.load %arg8[%c96_77, %c0_78] : memref<144x256xbf16, #tpu.memory_space<vmem>>, vector<16x256xbf16>
    tpu.vector_store %arg8[%c96_77, %c0_78], %99 {strides = array<i32>} : memref<144x256xbf16, #tpu.memory_space<vmem>>, vector<16x256xbf16>,
    %c0_79 = arith.constant 0 : index
    %c144_80 = arith.constant 144 : index
    %101 = vector.load %arg7[%c0_79, %c144_80] : memref<16x512xbf16, #tpu.memory_space<vmem>>, vector<16x256xbf16>
    %c112_81 = arith.constant 112 : index
    %c0_82 = arith.constant 0 : index
    %102 = vector.load %arg8[%c112_81, %c0_82] : memref<144x256xbf16, #tpu.memory_space<vmem>>, vector<16x256xbf16>
    tpu.vector_store %arg8[%c112_81, %c0_82], %101 {strides = array<i32>} : memref<144x256xbf16, #tpu.memory_space<vmem>>, vector<16x256xbf16>,
    %c0_83 = arith.constant 0 : index
    %c145_84 = arith.constant 145 : index
    %103 = vector.load %arg7[%c0_83, %c145_84] : memref<16x512xbf16, #tpu.memory_space<vmem>>, vector<16x256xbf16>
    %104 = arith.mulf %103, %37 : vector<16x256xbf16>
    %c128_85 = arith.constant 128 : index
    %c0_86 = arith.constant 0 : index
    %105 = vector.load %arg8[%c128_85, %c0_86] : memref<144x256xbf16, #tpu.memory_space<vmem>>, vector<16x256xbf16>
    tpu.vector_store %arg8[%c128_85, %c0_86], %104 {strides = array<i32>} : memref<144x256xbf16, #tpu.memory_space<vmem>>, vector<16x256xbf16>,
    %c0_87 = arith.constant 0 : index
    %c0_88 = arith.constant 0 : index
    %106 = vector.load %arg3[%c0_87, %c0_88] : memref<16x144xbf16, #tpu.memory_space<vmem>>, vector<16x144xbf16>
    %c0_89 = arith.constant 0 : index
    %c0_90 = arith.constant 0 : index
    %107 = vector.load %arg8[%c0_89, %c0_90] : memref<144x256xbf16, #tpu.memory_space<vmem>>, vector<144x256xbf16>
    %cst_91 = arith.constant dense<0.000000e+00> : vector<16x256xf32>
    %108 = tpu.matmul %106, %107, %cst_91 {dimension_numbers = #tpu.dot_dimension_numbers<[1], [0], [0], [1], [0, 0, 1, 1], [], []>} : vector<16x144xbf16>, vector<144x256xbf16>, vector<16x256xf32> -> vector<16x256xf32>
    %109 = vector.broadcast %8 : vector<16x1xf32> to vector<16x256xf32>
    %110 = arith.addf %108, %109 : vector<16x256xf32>
    %cst_92 = arith.constant dense<0.000000e+00> : vector<16xf32>
    %111 = vector.multi_reduction <add>, %110, %cst_92 [1] : vector<16x256xf32> to vector<16xf32>
    %112 = vector.shape_cast %111 : vector<16xf32> to vector<16x1xf32>
    %cst_93 = arith.constant 2.560000e+02 : f32
    %113 = vector.broadcast %cst_93 : f32 to vector<16x1xf32>
    %114 = arith.divf %112, %113 : vector<16x1xf32>
    %115 = arith.mulf %9, %114 : vector<16x1xf32>
    %cst_94 = arith.constant dense<0.000000e+00> : vector<1xf32>
    %116 = vector.multi_reduction <add>, %115, %cst_94 [0] : vector<16x1xf32> to vector<1xf32>
    %117 = vector.shape_cast %116 : vector<1xf32> to vector<1x1xf32>
    %cst_95 = arith.constant 0.000000e+00 : f32
    %118 = vector.broadcast %cst_95 : f32 to vector<1x1xf32>
    %119 = arith.maximumf %117, %118 : vector<1x1xf32>
    %120 = vector.broadcast %119 : vector<1x1xf32> to vector<16x1xf32>
    %121 = arith.mulf %10, %120 : vector<16x1xf32>
    %cst_96 = arith.constant dense<0.000000e+00> : vector<16xf32>
    %122 = vector.multi_reduction <add>, %121, %cst_96 [1] : vector<16x1xf32> to vector<16xf32>
    %123 = vector.shape_cast %122 : vector<16xf32> to vector<16x1xf32>
    %cst_97 = arith.constant 0.000000e+00 : f32
    %124 = vector.broadcast %cst_97 : f32 to vector<16x1xf32>
    %125 = arith.subf %124, %123 : vector<16x1xf32>
    %126 = math.exp %125 : vector<16x1xf32>
    %cst_98 = arith.constant 1.000000e+00 : f32
    %127 = vector.broadcast %cst_98 : f32 to vector<16x1xf32>
    %128 = arith.addf %127, %126 : vector<16x1xf32>
    %cst_99 = arith.constant 1.000000e+00 : f32
    %129 = vector.broadcast %cst_99 : f32 to vector<16x1xf32>
    %130 = arith.divf %129, %128 : vector<16x1xf32>
    %131 = vector.broadcast %130 : vector<16x1xf32> to vector<16x256xf32>
    %132 = arith.mulf %110, %131 : vector<16x256xf32>
    %133 = arith.addf %132, %39 : vector<16x256xf32>
    %c0_100 = arith.constant 0 : index
    %c0_101 = arith.constant 0 : index
    %c0_102 = arith.constant 0 : index
    %134 = vector.load %arg6[%c0_100, %c0_101, %c0_102] : memref<1x16x256xf32, #tpu.memory_space<vmem>>, vector<1x16x256xf32>
    %135 = vector.shape_cast %134 : vector<1x16x256xf32> to vector<16x256xf32>
    %136 = vector.shape_cast %133 : vector<16x256xf32> to vector<1x16x256xf32>
    tpu.vector_store %arg6[%c0_100, %c0_101, %c0_102], %136 {strides = array<i32>} : memref<1x16x256xf32, #tpu.memory_space<vmem>>, vector<1x16x256xf32>,
    return
  }
  func.func @transform_0(%arg0: i32) -> (i32, i32, i32) {
    %c0_i32 = arith.constant 0 : i32
    %c0_i32_0 = arith.constant 0 : i32
    %c0_i32_1 = arith.constant 0 : i32
    return %arg0, %c0_i32, %c0_i32_0 : i32, i32, i32
  }
  func.func @transform_1(%arg0: i32) -> (i32, i32) {
    %c0_i32 = arith.constant 0 : i32
    %c0_i32_0 = arith.constant 0 : i32
    %c0_i32_1 = arith.constant 0 : i32
    return %c0_i32, %c0_i32_0 : i32, i32
  }
  func.func @transform_2(%arg0: i32) -> (i32, i32) {
    %c0_i32 = arith.constant 0 : i32
    %c0_i32_0 = arith.constant 0 : i32
    %c0_i32_1 = arith.constant 0 : i32
    return %c0_i32, %c0_i32_0 : i32, i32
  }
  func.func @transform_3(%arg0: i32) -> (i32, i32) {
    %c0_i32 = arith.constant 0 : i32
    %c0_i32_0 = arith.constant 0 : i32
    %c0_i32_1 = arith.constant 0 : i32
    return %c0_i32, %c0_i32_0 : i32, i32
  }
  func.func @transform_4(%arg0: i32) -> (i32, i32) {
    %c0_i32 = arith.constant 0 : i32
    %c0_i32_0 = arith.constant 0 : i32
    %c0_i32_1 = arith.constant 0 : i32
    return %c0_i32, %c0_i32_0 : i32, i32
  }
  func.func @transform_5(%arg0: i32) -> (i32, i32, i32) {
    %c0_i32 = arith.constant 0 : i32
    %c0_i32_0 = arith.constant 0 : i32
    %c0_i32_1 = arith.constant 0 : i32
    return %arg0, %c0_i32, %c0_i32_0 : i32, i32, i32
  }
}

</mosaic_0001>

<bundles_post_ra>
// kernel: tpu_custom_call.1
= control target key start
LH: loop header
LB: loop body
LE: loop exit
PB: predicated region body
PF: predicated region fallthrough
CT: control target
= control target key end

     0   :  { %10 = vsyncpa [#allocation5], 0  ;;  %s2637_s0 = inlined_call_operand.hbm [shape: f32[2,16,256], index: 0, kind: input, shape index: {}, may-alias: {0,5}]   ;;  %s2638_s1 = inlined_call_operand.vmem [shape: bf16[16,144], index: 1, kind: input, shape index: {}]   ;;  %s2639_s2 = inlined_call_operand.vmem [shape: bf16[16,144], index: 2, kind: input, shape index: {}]   ;;  %s2640_s3 = inlined_call_operand.vmem [shape: f32[16,5], index: 3, kind: input, shape index: {}]   ;;  %s2641_s4 = inlined_call_operand.vmem [shape: f32[16,2], index: 4, kind: input, shape index: {}]   ;;  %s2642_s5 = inlined_call_operand.hbm [shape: f32[2,16,256], index: 5, kind: output, shape index: {}, may-alias: {0,5}]  }
   0x1   :  { %12 = vsyncpa [#allocation5 + $0x1], 0 }
   0x2   :  { %13 = vsyncpa [#allocation6], 0 }
   0x3   :  { %15 = vsyncpa [#allocation6 + $0x1], 0  ;;  %s2119_s18 = smov 0   ;;  %s2121_s19 = smov 0  }
   0x4   :  { %s2123_s20 = smov 0   ;;  %s2125_s21 = smov 0  }
   0x5 LB: > { %s2140_s22 = sadd.s32 4294967295, %s2069_s21   ;;  %s1629_s23 = sadd.s32 4294967294, %s2069_s21   ;;  %s2069_s21 = sphi %s2125_s21, %s2652_s21   ;;  %s2065_s20 = sphi %s2123_s20, %s2651_s20   ;;  %s2061_s19 = sphi %s2121_s19, %s2650_s19   ;;  %s2057_s18 = sphi %s2119_s18, %s2649_s18  }
   0x6   : > { %s2144_s24 = sadd.s32 1, %s2069_s21   ;;  %s28_s25 = sadd.s32 1, %s2065_s20 }
   0x7   : > { %s25_s26 = ssub.s32 %s2069_s21, %s2144_s24  ;;  %p35_p0 = scmp.ne.s32.totalorder %s2065_s20, %s2061_s19 }
   0x8   : > { %p26_p1 = scmp.eq.s32.totalorder %s25_s26, 0  ;;  %p36_p2 = scmp.eq.s32.totalorder %s2069_s21, 0 }
   0x9   : > { %p41_p3 = scmp.ne.s32.totalorder %s2061_s19, %s2057_s18  ;;  %p42_p4 = scmp.eq.s32.totalorder %s2140_s22, 0 }
   0xa   : > { %s2156_s27 = scalar_select %p26_p1, %s2065_s20, %s28_s25  }
   0xb   : > { %p2158_p5 = por %p36_p2, %p35_p0  ;;  %p2162_p6 = por %p42_p4, %p41_p3 }
   0xc   : > { %p149_p7 = scmp.eq.s32.totalorder %s2140_s22, 1  ;;  %p155_p8 = scmp.eq.s32.totalorder %s1629_s23, 1 }
   0xd   : > { %p1865_p10 = scmp.lt.s32.totalorder %s2069_s21, 2  ;;  %s187_s7 = sand.u32 1, %s2065_s20  }
   0xe   : > { %p2169_p11 = por %p149_p7, %p35_p0  ;;  %p2173_p12 = por %p155_p8, %p41_p3 }
   0xf   : > { %s1811_s8 = sshll.u32 %s2069_s21, 5  ;;  %s1632_s9 = sshll.u32 %s187_s7, 5 }
  0x10   : > { %s196_s12 = scalar_lea.hbm %s2637_s0, %s1811_s8  ;;  %s191_s14 = scalar_lea.vmem [#allocation4], %s1632_s9 }
  0x11   : > { %s197_s13 = sshll.u32 %s196_s12, 4  ;;  %s199_s15 = sshll.u32 %s191_s14, 4  ;;  %s198_s13 = int_to_ptr.hbm [resolvable:$true] %s197_s13  ;;  %s200_s15 = int_to_ptr.vmem [resolvable:$true] %s199_s15 }
  0x12   : > { %p2184_p13 = pnand %p1865_p10, %p2158_p5  ;;  %p1635_p0 = scmp.ge.s32.totalorder %s2069_s21, 1 }
  0x13   : > { %p207_p1 = scmp.lt.s32.totalorder %s2069_s21, 3  ;;  %s188_s17 = scalar_lea.sflag [#allocation5], %s187_s7 }
  0x14   : > { %s1973_s23 = sshra.s32 %s198_s13, 4  ;;  %p1977_p3 = pneg %p2184_p13  ;;  %s1974_s23 = int_to_ptr.hbm [resolvable:$true] %s1973_s23 }
  0x15   : > { %s1975_s25 = scalar_lea.hbm %s1974_s23, 32  ;;  %s1980_s28 = scalar_lea.hbm %s2637_s0, 64 }
  0x16   : > { %p1976_p2 = scmp.ne.s32.totalorder %s1974_s23, %s1975_s25  ;;  %p1981_p5 = scmp.lt.s32.totalorder %s1974_s23, %s2637_s0 }
  0x17   : > { %p1982_p8 = scmp.lt.s32.totalorder %s1980_s28, %s1975_s25 }
  0x18   : > { %p1978_p4 = pnand %p1977_p3, %p1976_p2 }
  0x19   : > { %p1983_p10 = por %p1982_p8, %p1981_p5 }
  0x1a   : > { %p1979_p7 = pneg %p1978_p4 }
  0x1c   : > { %p1984_p9 = pnand %p1983_p10, %p1979_p7 }
  0x1e   : > { %1987 = shalt.err (!%p1984_p9)
}
  0x1f   : > { %s2071_s7 = smov 256   ;;  %s2072_s11 = smov 16  }
  0x20   : > { %1860 = dma.hbm_to_vmem [thread:$0]  (!%p2184_p13), %s198_s13, 512, %s200_s15, %s188_s17, %s2071_s7, %s2071_s7, %s2072_s11  }
  0x21   : > { %p208_p2 = pnand %p1635_p0, %p207_p1 }
  0x22   : > { %s2205_s12 = sand.u32 (!%p208_p2), 1, %s2061_s19  }
  0x23   : > { %211 = sbr.rel (%p208_p2) target bundleno = 1232 (0x4d0), region = 40  ;;  %s1636_s14 = sshll.u32 (!%p208_p2), %s2205_s12, 5 }
  0x24   : > { %s214_s23 = scalar_lea.sflag (!%p208_p2), [#allocation5], %s2205_s12  ;;  %s2211_s25 = scalar_lea.vmem (!%p208_p2), [#allocation4], %s1636_s14 }
  0x28   : > { %2048 = dma.done.wait (%p2162_p6), %s214_s23, 512  }
  0x29   : > { %2050 = vsyncadd (%p2162_p6), %s214_s23, 4294966784  ;;  %v254_v0 = vlaneseq  ;;  %v2073_v1 = vmov 1   ;;  %v2074_v2 = vmov 0   ;;  %v2221_v7 = vld [vmem:[%s2640_s3] sm:$0xff]  ;;  %v2075_v8 = vmov 0.0   ;;  %s2076_s29 = smov 15  }
  0x2a   : > { %1918 = vset.pattern.permute.xlu1 %v2073_v1  ;;  %1917 = vset.pattern.permute.xlu0 %v2074_v2  ;;  %246 = vst [vmem:[#allocation2] sm:$0xf] %v2074_v2  ;;  %v2229_v12 = vld [vmem:[%s2640_s3 + $0x8] sm:$0xff]  ;;  %s2077_s26 = smov 1   ;;  %s2078_s8 = smov 113   ;;  %v295_v38 = vld [vmem:[%s2211_s25] sm:$0xff] }
  0x2b   : > { %247 = vst [vmem:[#allocation2 + $0x10] sm:$0xf] %v2074_v2  ;;  %v255_v3 = vand.u32 127, %v254_v0  ;;  %314 = vperm.xlu1 %1918, %v2221_v7   ;;  %301 = vperm.xlu0 %1917, %v2221_v7   ;;  %s2079_s28 = smov 127   ;;  %s2080_s9 = smov 111   ;;  %v296_v39 = vld [vmem:[%s2211_s25 + $0x8] sm:$0xff] }
  0x2c   : > { %248 = vst [vmem:[#allocation2 + $0xc] sm:$0xf] %v2074_v2  ;;  %s2081_s10 = smov 112   ;;  %s2082_s7 = smov 17   ;;  %v297_v47 = vld [vmem:[%s2211_s25 + $0x10] sm:$0xff]  ;;  %v298_v48 = vld [vmem:[%s2211_s25 + $0x18] sm:$0xff] }
  0x2d   : > { %249 = vst [vmem:[#allocation2 + $0x1c] sm:$0xf] %v2074_v2  ;;  %v256_v4 = vadd.s32 128, %v255_v3  ;;  %v261_v5 = vand.u32 15, %v255_v3  ;;  %vm467_vm4 = vcmask 121856   ;;  %s2083_s11 = smov 16  }
  0x2e   : > { %vm489_vm5 = vcmask 1039360   ;;  %vm521_vm6 = vcmask 7168   ;;  %vm435_vm7 = vcmask 924672   ;;  %vm347_vm8 = vcmask 908288  }
  0x2f   : > { %v268_v6 = vand.u32 15, %v256_v4  ;;  %vm281_vm0 = vcmp.ge.s32.totalorder %v261_v5, 1  ;;  %vm288_vm2 = vcmp.le.s32.totalorder %v261_v5, 14  ;;  %vm380_vm9 = vcmask 138240  }
  0x30   : > { %v1638_v9 = vsel %vm281_vm0, 1.0, %v2075_v8  ;;  %v1640_v13 = vsel %vm288_vm2, 1.0, %v2075_v8  ;;  %vm378_vm10 = vcmask 1043456   ;;  %vm662_vm11 = vcmask 916480  }
  0x31   : > { %vm282_vm1 = vcmp.ge.s32.totalorder %v268_v6, 1  ;;  %vm289_vm3 = vcmp.le.s32.totalorder %v268_v6, 14  ;;  %vm409_vm12 = vcmask 130048  }
  0x32   : > { %v1639_v10 = vsel %vm282_vm1, 1.0, %v2075_v8  ;;  %v1641_v14 = vsel %vm289_vm3, 1.0, %v2075_v8 }
  0x33   : > { %v1919_v11 = vpack.i.bf16 %v1639_v10, %v1638_v9  ;;  %318 = vperm.xlu1 %1918, %v2229_v12   ;;  %306 = vperm.xlu0 %1917, %v2229_v12   ;;  %v1924_v15 = vpack.i.bf16 %v1641_v14, %v1640_v13  ;;  %v642_v16 = vld [vmem:[#allocation2 + $0xc] sm:$0xf] }
  0x34   : > { %v644_v17 = vld [vmem:[#allocation2 + $0x1c] sm:$0xf]  ;;  %v588_v18 = vld [vmem:[#allocation2 + $0xc] sm:$0xf] }
  0x35   : > { %1920 = vrot.lane.b32.xlu2 %v1919_v11, %s2076_s29  ;;  %v590_v19 = vld [vmem:[#allocation2 + $0x1c] sm:$0xf]  ;;  %v593_v20 = vunpack.c.l.bf16 %v588_v18  ;;  %v534_v27 = vld [vmem:[#allocation2 + $0xc] sm:$0xf] }
  0x36   : > { %v596_v21 = vunpack.c.l.bf16 %v590_v19  ;;  %v536_v26 = vld [vmem:[#allocation2 + $0x1c] sm:$0xf]  ;;  %v539_v31 = vunpack.c.l.bf16 %v534_v27 }
  0x37   : > { %v542_v30 = vunpack.c.l.bf16 %v536_v26 }
  0x3b   : > { %1935 = vrot.lane.b32.xlu1 %v1924_v15, %s2078_s8  ;;  %1930 = vrot.lane.b32.xlu0 %v1919_v11, %s2079_s28 }
  0x3d   : > { %1925 = vrot.lane.b32.xlu2 %v1924_v15, %s2077_s26 }
  0x43   : > { %651 = vrot.lane.b32.xlu1 %v642_v16, %s2081_s10  ;;  %655 = vrot.lane.b32.xlu0 %v644_v17, %s2081_s10 }
  0x45   : > { %1940 = vrot.lane.b32.xlu2 %v1919_v11, %s2080_s9 }
  0x4b   : > { %1945 = vrot.lane.b32.xlu1 %v1924_v15, %s2082_s7 }
  0x8f   : > { %v1921_v22 = vpop.permute.xlu2 %1920 }
  0x90   : > { %v2240_v23 = vunpack.i.h.bf16 %v1921_v22  ;;  %v2257_v55 = vunpack.i.l.bf16 %v1921_v22 }
  0x92   : > { %v608_v24 = vmul.f32 %v2240_v23, %v593_v20  ;;  %v611_v25 = vmul.f32 %v2240_v23, %v596_v21  ;;  %v2269_v62 = vsel %vm467_vm4, %v2257_v55, %v2240_v23 }
  0x94   : > { %v613_v28 = vpack.c.bf16 %v608_v24, %v608_v24  ;;  %v615_v29 = vpack.c.bf16 %v611_v25, %v611_v25 }
  0x96   : > { %622 = vrot.lane.b32.xlu0 %v613_v28, %s2078_s8  ;;  %626 = vrot.lane.b32.xlu2 %v615_v29, %s2078_s8 }
  0x97   : > { %v1926_v32 = vpop.permute.xlu2 %1925 }
  0x98   : > { %v2246_v33 = vunpack.i.h.bf16 %v1926_v32  ;;  %v2279_v4 = vunpack.i.l.bf16 %v1926_v32 }
  0x9a   : > { %v557_v34 = vmul.f32 %v2246_v33, %v542_v30  ;;  %v554_v35 = vmul.f32 %v2246_v33, %v539_v31  ;;  %v2296_v15 = vsel %vm521_vm6, %v2279_v4, %v2246_v33 }
  0x9c   : > { %v561_v36 = vpack.c.bf16 %v557_v34, %v557_v34  ;;  %v559_v37 = vpack.c.bf16 %v554_v35, %v554_v35 }
  0x9d   : > { %v315_v40 = vpop.permute.xlu1 %314  ;;  %v302_v41 = vpop.permute.xlu0 %301 }
  0x9e   : > { %572 = vrot.lane.b32.xlu0 %v561_v36, %s2079_s28  ;;  %568 = vrot.lane.b32.xlu1 %v559_v37, %s2079_s28  ;;  %v309_v42 = vmul.f32 %v302_v41, %v295_v38  ;;  %v310_v43 = vmul.f32 %v302_v41, %v296_v39 }
  0xa0   : > { %v321_v44 = vadd.f32 %v315_v40, %v309_v42  ;;  %v322_v45 = vadd.f32 %v315_v40, %v310_v43 }
  0xa2   : > { %v325_v46 = vpack.c.bf16 %v322_v45, %v321_v44  ;;  %v1941_v44 = vpop.permute.xlu2 %1940 }
  0xa4   : > { %327 = vst [vmem:[#allocation2 + $0x4] sm:$0xff] %v325_v46  ;;  %v2281_v6 = vunpack.c.l.bf16 %v325_v46  ;;  %v2283_v8 = vunpack.c.h.bf16 %v325_v46 }
  0xa5   : > { %v307_v49 = vpop.permute.xlu0 %306  ;;  %531 = vst [vmem:[#allocation3 + $0x40] sm:$0xff] %v325_v46  ;;  %v319_v52 = vpop.permute.xlu1 %318 }
  0xa6   : > { %649 = vrot.lane.b32.xlu0 %v325_v46, %s2081_s10  ;;  %v311_v50 = vmul.f32 %v307_v49, %v297_v47  ;;  %v312_v51 = vmul.f32 %v307_v49, %v298_v48  ;;  %v606_v18 = vmul.f32 %v2257_v55, %v2281_v6  ;;  %v607_v19 = vmul.f32 %v2269_v62, %v2283_v8 }
  0xa7   : > { %v552_v20 = vmul.f32 %v2279_v4, %v2281_v6  ;;  %v553_v21 = vmul.f32 %v2283_v8, %v2296_v15  ;;  %v2084_v48 = vmov 2  }
  0xa8   : > { %v323_v53 = vadd.f32 %v319_v52, %v311_v50  ;;  %v324_v54 = vadd.f32 %v319_v52, %v312_v51  ;;  %v612_v25 = vpack.c.bf16 %v607_v19, %v606_v18  ;;  %1950 = vset.pattern.permute.xlu1 %v2084_v48  ;;  %1949 = vset.pattern.permute.xlu0 %v2084_v48 }
  0xa9   : > { %v558_v27 = vpack.c.bf16 %v553_v21, %v552_v20 }
  0xaa   : > { %v326_v56 = vpack.c.bf16 %v324_v54, %v323_v53  ;;  %v2335_v53 = vunpack.i.h.bf16 %v1941_v44  ;;  %v2337_v54 = vunpack.i.l.bf16 %v1941_v44 }
  0xab   : > { %v389_v57 = vld [vmem:[#allocation2 + $0x8] sm:$0xf]  ;;  %v388_v58 = vld [vmem:[#allocation2] sm:$0xff] }
  0xac   : > { %328 = vst [vmem:[#allocation2 + $0x14] sm:$0xff] %v326_v56  ;;  %398 = vrot.lane.b32.xlu1 %v389_v57, %s2083_s11  ;;  %653 = vrot.lane.b32.xlu2 %v326_v56, %s2081_s10  ;;  %v2261_v59 = vunpack.c.l.bf16 %v326_v56  ;;  %v2263_v60 = vunpack.c.h.bf16 %v326_v56  ;;  %v479_v13 = vunpack.c.l.bf16 %v388_v58  ;;  %v480_v14 = vunpack.c.h.bf16 %v388_v58  ;;  %v476_v39 = vld [vmem:[#allocation2 + $0x8] sm:$0xf] }
  0xad   : > { %v1931_v61 = vpop.permute.xlu0 %1930  ;;  %532 = vst [vmem:[#allocation3 + $0x48] sm:$0xff] %v326_v56  ;;  %v1936_v30 = vpop.permute.xlu1 %1935  ;;  %v418_v42 = vld [vmem:[#allocation2 + $0x8] sm:$0xf]  ;;  %v481_v45 = vunpack.c.l.bf16 %v476_v39 }
  0xae   : > { %396 = vrot.lane.b32.xlu0 %v388_v58, %s2083_s11  ;;  %v2271_v63 = vunpack.i.h.bf16 %v1931_v61  ;;  %v2273_v0 = vunpack.i.l.bf16 %v1931_v61  ;;  %v609_v2 = vmul.f32 %v2257_v55, %v2261_v59  ;;  %v610_v3 = vmul.f32 %v2269_v62, %v2263_v60 }
  0xaf   : > { %v555_v32 = vmul.f32 %v2279_v4, %v2261_v59  ;;  %v556_v34 = vmul.f32 %v2263_v60, %v2296_v15  ;;  %v2318_v37 = vunpack.i.h.bf16 %v1936_v30  ;;  %v2320_v38 = vunpack.i.l.bf16 %v1936_v30 }
  0xb0   : > { %v614_v5 = vpack.c.bf16 %v610_v3, %v609_v2  ;;  %v2288_v11 = vsel %vm489_vm5, %v2273_v0, %v2271_v63  ;;  %v494_v16 = vmul.f32 %v2273_v0, %v479_v13  ;;  %v423_v47 = vunpack.c.l.bf16 %v418_v42 }
  0xb1   : > { %v495_v17 = vmul.f32 %v2288_v11, %v480_v14  ;;  %v560_v41 = vpack.c.bf16 %v556_v34, %v555_v32  ;;  %v2328_v46 = vsel %vm435_vm7, %v2320_v38, %v2318_v37  ;;  %v496_v52 = vmul.f32 %v2271_v63, %v481_v45  ;;  %v330_v34 = vld [vmem:[#allocation2 + $0x8] sm:$0xf] }
  0xb2   : > { %v442_v56 = vmul.f32 %v2318_v37, %v423_v47  ;;  %v2343_v2 = vsel %vm347_vm8, %v2337_v54, %v2335_v53  ;;  %v352_v3 = vmul.f32 %v2337_v54, %v479_v13 }
  0xb3   : > { %v390_v9 = vld [vmem:[#allocation2 + $0x10] sm:$0xff]  ;;  %v391_v10 = vld [vmem:[#allocation2 + $0x18] sm:$0xf]  ;;  %v500_v24 = vpack.c.bf16 %v495_v17, %v494_v16  ;;  %v501_v58 = vpack.c.bf16 %v496_v52, %v496_v52  ;;  %v671_v16 = vld [vmem:[#allocation2 + $0xc] sm:$0xf]  ;;  %v2085_v17 = vmov 3  }
  0xb4   : > { %624 = vrot.lane.b32.xlu1 %v614_v5, %s2078_s8  ;;  %400 = vrot.lane.b32.xlu2 %v390_v9, %s2083_s11  ;;  %v478_v22 = vld [vmem:[#allocation2 + $0x18] sm:$0xf]  ;;  %v482_v28 = vunpack.c.l.bf16 %v390_v9  ;;  %v483_v29 = vunpack.c.h.bf16 %v390_v9  ;;  %v447_v61 = vpack.c.bf16 %v442_v56, %v442_v56  ;;  %v353_v5 = vmul.f32 %v480_v14, %v2343_v2 }
  0xb5   : > { %v484_v26 = vunpack.c.l.bf16 %v478_v22  ;;  %v2330_v49 = vpop.permute.xlu1 %651  ;;  %v440_v9 = vmul.f32 %v2320_v38, %v479_v13  ;;  %1951 = vset.pattern.permute.xlu2 %v2085_v17  ;;  %v332_v20 = vld [vmem:[#allocation2 + $0x18] sm:$0xf] }
  0xb6   : > { %402 = vrot.lane.b32.xlu0 %v391_v10, %s2083_s11  ;;  %v497_v35 = vmul.f32 %v2273_v0, %v482_v28  ;;  %v498_v36 = vmul.f32 %v2288_v11, %v483_v29  ;;  %v443_v50 = vmul.f32 %v2320_v38, %v482_v28  ;;  %v444_v51 = vmul.f32 %v483_v29, %v2328_v46  ;;  %v420_v21 = vld [vmem:[#allocation2 + $0x18] sm:$0xf] }
  0xb7   : > { %v499_v31 = vmul.f32 %v2271_v63, %v484_v26  ;;  %v441_v10 = vmul.f32 %v480_v14, %v2328_v46  ;;  %v355_v18 = vmul.f32 %v2337_v54, %v482_v28  ;;  %v356_v19 = vmul.f32 %v483_v29, %v2343_v2 }
  0xb8   : > { %v502_v43 = vpack.c.bf16 %v498_v36, %v497_v35  ;;  %v448_v57 = vpack.c.bf16 %v444_v51, %v443_v50  ;;  %v426_v30 = vunpack.c.l.bf16 %v420_v21  ;;  %v1146_v51 = vld [vmem:[#allocation2 + $0x1c] sm:$0xf] }
  0xb9   : > { %v503_v40 = vpack.c.bf16 %v499_v31, %v499_v31  ;;  %v446_v26 = vpack.c.bf16 %v441_v10, %v440_v9  ;;  %v360_v13 = vpack.c.bf16 %v356_v19, %v355_v18  ;;  %v656_v19 = vpop.permute.xlu0 %655 }
  0xba   : > { %v445_v29 = vmul.f32 %v2318_v37, %v426_v30 }
  0xbc   : > { %508 = vrot.lane.b32.xlu1 %v500_v24, %s2077_s26  ;;  %620 = vrot.lane.b32.xlu2 %v612_v25, %s2078_s8  ;;  %v676_v24 = vunpack.c.l.bf16 %v671_v16  ;;  %v358_v25 = vpack.c.bf16 %v353_v5, %v352_v3  ;;  %v449_v39 = vpack.c.bf16 %v445_v29, %v445_v29  ;;  %v1218_v29 = vld [vmem:[#allocation2 + $0x1c] sm:$0xf] }
  0xbd   : > { %v1946_v22 = vpop.permute.xlu1 %1945 }
  0xbe   : > { %566 = vrot.lane.b32.xlu0 %v558_v27, %s2079_s28  ;;  %v338_v27 = vunpack.c.l.bf16 %v332_v20  ;;  %v2354_v31 = vunpack.i.h.bf16 %v1946_v22  ;;  %v2362_v32 = vunpack.i.l.bf16 %v1946_v22  ;;  %v1102_v20 = vld [vmem:[#allocation2 + $0x1c] sm:$0xf] }
  0xc0   : > { %v691_v14 = vmul.f32 %v2354_v31, %v676_v24  ;;  %v357_v28 = vmul.f32 %v2335_v53, %v338_v27  ;;  %v692_v42 = vmul.f32 %v2362_v32, %v2261_v59  ;;  %v689_v48 = vmul.f32 %v2362_v32, %v2281_v6  ;;  %v673_v59 = vld [vmem:[#allocation2 + $0x1c] sm:$0xf] }
  0xc1   : > { %v679_v56 = vunpack.c.l.bf16 %v673_v59  ;;  %v1108_v24 = vunpack.c.l.bf16 %v1102_v20 }
  0xc2   : > { %v696_v35 = vpack.c.bf16 %v691_v14, %v691_v14  ;;  %v361_v36 = vpack.c.bf16 %v357_v28, %v357_v28 }
  0xc4   : > { %514 = vrot.lane.b32.xlu1 %v503_v40, %s2077_s26  ;;  %570 = vrot.lane.b32.xlu2 %v560_v41, %s2079_s28  ;;  %v335_v40 = vunpack.c.l.bf16 %v330_v34  ;;  %v2367_v41 = vsel %vm380_vm9, %v2362_v32, %v2354_v31 }
  0xc5   : > { %v690_v50 = vmul.f32 %v2367_v41, %v2283_v8  ;;  %v1216_v8 = vld [vmem:[#allocation2 + $0xc] sm:$0xf] }
  0xc6   : > { %512 = vrot.lane.b32.xlu0 %v502_v43, %s2077_s26  ;;  %v693_v43 = vmul.f32 %v2367_v41, %v2263_v60  ;;  %v354_v44 = vmul.f32 %v2335_v53, %v335_v40  ;;  %v1188_v60 = vld [vmem:[#allocation2 + $0xc] sm:$0xf]  ;;  %v1221_v10 = vunpack.c.l.bf16 %v1216_v8 }
  0xc7   : > { %v695_v52 = vpack.c.bf16 %v690_v50, %v689_v48  ;;  %v658_v48 = vrot.slane %v2330_v49, 4 }
  0xc8   : > { %v697_v45 = vpack.c.bf16 %v693_v43, %v692_v42  ;;  %v359_v47 = vpack.c.bf16 %v354_v44, %v354_v44  ;;  %v1227_v18 = vmul.f32 %v2354_v31, %v1221_v10 }
  0xca   : > { %v1232_v22 = vpack.c.bf16 %v1227_v18, %v1227_v18 }
  0xcc   : > { %458 = vrot.lane.b32.xlu1 %v448_v57, %s2076_s29  ;;  %510 = vrot.lane.b32.xlu2 %v501_v58, %s2077_s26  ;;  %v1152_v57 = vunpack.c.l.bf16 %v1146_v51  ;;  %v694_v58 = vmul.f32 %v2354_v31, %v679_v56 }
  0xce   : > { %456 = vrot.lane.b32.xlu0 %v447_v61, %s2076_s29  ;;  %v1158_v6 = vmul.f32 %v2240_v23, %v1152_v57  ;;  %v1144_v61 = vld [vmem:[#allocation2 + $0xc] sm:$0xf]  ;;  %v698_v3 = vpack.c.bf16 %v694_v58, %v694_v58 }
  0xcf   : > { %v1149_v9 = vunpack.c.l.bf16 %v1144_v61 }
  0xd0   : > { %v1162_v5 = vpack.c.bf16 %v1158_v6, %v1158_v6 }
  0xd1   : > { %v1155_v16 = vmul.f32 %v2240_v23, %v1149_v9 }
  0xd3   : > { %v1160_v21 = vpack.c.bf16 %v1155_v16, %v1155_v16 }
  0xd4   : > { %366 = vrot.lane.b32.xlu1 %v358_v25, %s2082_s7  ;;  %454 = vrot.lane.b32.xlu2 %v446_v26, %s2076_s29  ;;  %v1100_v25 = vld [vmem:[#allocation2 + $0xc] sm:$0xf]  ;;  %v1190_v26 = vld [vmem:[#allocation2 + $0x1c] sm:$0xf] }
  0xd5   : > { %v1105_v27 = vunpack.c.l.bf16 %v1100_v25 }
  0xd6   : > { %370 = vrot.lane.b32.xlu0 %v360_v13, %s2082_s7  ;;  %v660_v13 = vrot.slane %v656_v19, 4 }
  0xd7   : > { %v1111_v14 = vmul.f32 %v2246_v33, %v1105_v27 }
  0xdc   : > { %372 = vrot.lane.b32.xlu1 %v361_v36, %s2082_s7  ;;  %460 = vrot.lane.b32.xlu2 %v449_v39, %s2076_s29  ;;  %v1116_v36 = vpack.c.bf16 %v1111_v14, %v1111_v14  ;;  %v1224_v39 = vunpack.c.l.bf16 %v1218_v29 }
  0xde   : > { %705 = vrot.lane.b32.xlu0 %v696_v35, %s2080_s9  ;;  %v1230_v43 = vmul.f32 %v2354_v31, %v1224_v39 }
  0xe0   : > { %v1234_v44 = vpack.c.bf16 %v1230_v43, %v1230_v43 }
  0xe4   : > { %707 = vrot.lane.b32.xlu1 %v697_v45, %s2080_s9  ;;  %368 = vrot.lane.b32.xlu2 %v359_v47, %s2082_s7 }
  0xe6   : > { %745 = vperm.xlu0 %1949, %v2221_v7  }
  0xec   : > { %749 = vperm.xlu1 %1950, %v2229_v12   ;;  %703 = vrot.lane.b32.xlu2 %v695_v52, %s2080_s9 }
  0xee   : > { %1197 = vrot.lane.b32.xlu0 %v1188_v60, %s2081_s10 }
  0xef   : > { %1956 = vset.pattern.permute.xlu0 %v2073_v1 }
  0xf4   : > { %1952 = vset.pattern.permute.xlu1 %v2085_v17  ;;  %709 = vrot.lane.b32.xlu2 %v698_v3, %s2080_s9  ;;  %v2398_v17 = vpop.permute.xlu2 %626 }
  0xf5   : > { %920 = vperm.xlu1 %1952, %v2229_v12   ;;  %v1114_v12 = vmul.f32 %v2246_v33, %v1108_v24 }
  0xf6   : > { %1173 = vrot.lane.b32.xlu0 %v1162_v5, %s2078_s8 }
  0xf7   : > { %v1118_v30 = vpack.c.bf16 %v1114_v12, %v1114_v12 }
  0xfc   : > { %916 = vperm.xlu2 %1951, %v2221_v7  }
  0xfd   : > { %1169 = vrot.lane.b32.xlu1 %v1160_v21, %s2078_s8 }
  0xfe   : > { %1241 = vrot.lane.b32.xlu0 %v1232_v22, %s2080_s9 }
 0x104   : > { %1201 = vrot.lane.b32.xlu2 %v1190_v26, %s2081_s10  ;;  %v631_v26 = vrot.slane %v2398_v17, 4 }
 0x105   : > { %1129 = vrot.lane.b32.xlu1 %v1118_v30, %s2079_s28 }
 0x106   : > { %v654_v7 = vpop.permute.xlu2 %653 }
 0x107   : > { %v659_v28 = vrot.slane %v654_v7, 4 }
 0x108   : > { %v623_v23 = vpop.permute.xlu0 %622 }
 0x109   : > { %v664_v34 = vsel %vm378_vm10, %v659_v28, %v660_v13  ;;  %v629_v50 = vrot.slane %v623_v23, 4 }
 0x10a   : > { %v665_v35 = vsel %vm662_vm11, %v654_v7, %v664_v34 }
 0x10b   : > { %669 = vst [vmem:[#allocation3 + $0x78] sm:$0xff] %v665_v35 }
 0x10c   : > { %1125 = vrot.lane.b32.xlu2 %v1116_v36, %s2079_s28 }
 0x10e   : > { %v401_v42 = vpop.permute.xlu2 %400 }
 0x10f   : > { %v406_v30 = vrot.slane %v401_v42, 4 }
 0x110   : > { %v573_v40 = vpop.permute.xlu0 %572  ;;  %v569_v45 = vpop.permute.xlu1 %568 }
 0x111   : > { %v577_v6 = vrot.slane %v573_v40, 4  ;;  %v575_v17 = vrot.slane %v569_v45, 4 }
 0x112   : > { %v1829_v9 = vld [vmem:[#allocation3 + $0x74] sm:$0xf0]  ;;  %v1710_v20 = vld [vmem:[#allocation3 + $0x78] sm:$0xf0] }
 0x114   : > { %1245 = vrot.lane.b32.xlu2 %v1234_v44, %s2080_s9 }
 0x116   : > { %v621_v47 = vpop.permute.xlu2 %620 }
 0x117   : > { %v628_v51 = vrot.slane %v621_v47, 4 }
 0x118   : > { %v650_v33 = vpop.permute.xlu0 %649 }
 0x119   : > { %v657_v59 = vrot.slane %v650_v33, 4  ;;  %v632_v60 = vsel %vm378_vm10, %v628_v51, %v629_v50 }
 0x11a   : > { %v634_v57 = vsel %vm435_vm7, %v621_v47, %v632_v60 }
 0x11b   : > { %v661_v52 = vsel %vm378_vm10, %v657_v59, %v658_v48  ;;  %639 = vst [vmem:[#allocation3 + $0x60] sm:$0xff] %v634_v57 }
 0x11c   : > { %v663_v56 = vsel %vm662_vm11, %v650_v33, %v661_v52 }
 0x11d   : > { %668 = vst [vmem:[#allocation3 + $0x70] sm:$0xff] %v663_v56 }
 0x11e   : > { %v399_v31 = vpop.permute.xlu1 %398  ;;  %v571_v58 = vpop.permute.xlu2 %570 }
 0x11f   : > { %v405_v61 = vrot.slane %v399_v31, 4  ;;  %v576_v8 = vrot.slane %v571_v58, 4 }
 0x120   : > { %v397_v3 = vpop.permute.xlu0 %396 }
 0x121   : > { %v404_v49 = vrot.slane %v397_v3, 4  ;;  %v581_v5 = vsel %vm378_vm10, %v576_v8, %v577_v6 }
 0x122   : > { %v582_v10 = vsel %vm489_vm5, %v571_v58, %v581_v5  ;;  %v1700_v33 = vld [vmem:[#allocation3 + $0x60] sm:$0xf]  ;;  %v1826_v59 = vld [vmem:[#allocation3 + $0x64] sm:$0xf] }
 0x123   : > { %v408_v16 = vsel %vm378_vm10, %v404_v49, %v405_v61  ;;  %586 = vst [vmem:[#allocation3 + $0x58] sm:$0xff] %v582_v10 }
 0x124   : > { %v1708_v18 = vld [vmem:[#allocation3 + $0x70] sm:$0xf]  ;;  %v1828_v19 = vld [vmem:[#allocation3 + $0x74] sm:$0xf]  ;;  %v410_v21 = vsel %vm409_vm12, %v397_v3, %v408_v16  ;;  %v1823_v16 = vld [vmem:[#allocation3 + $0x44] sm:$0xf0] }
 0x125   : > { %v1709_v22 = vor.u32 %v1829_v9, %v1708_v18  ;;  %v1713_v24 = vor.u32 %v1828_v19, %v1710_v20  ;;  %415 = vst [vmem:[#allocation3 + $0x10] sm:$0xff] %v410_v21  ;;  %v1686_v18 = vld [vmem:[#allocation3 + $0x48] sm:$0xf0] }
 0x126   : > { %v625_v12 = vpop.permute.xlu1 %624  ;;  %v511_v25 = vpop.permute.xlu2 %510 }
 0x127   : > { %855 = vmatpush.bf16.msra.mxu0 %v1709_v22  ;;  %883 = vmatpush.bf16.msra.mxu2 %v1713_v24  ;;  %v630_v23 = vrot.slane %v625_v12, 4  ;;  %v517_v36 = vrot.slane %v511_v25, 4  ;;  %v1684_v24 = vld [vmem:[#allocation3 + $0x40] sm:$0xf] }
 0x128   : > { %v403_v27 = vpop.permute.xlu0 %402 }
 0x129   : > { %v407_v13 = vrot.slane %v403_v27, 4  ;;  %v635_v7 = vsel %vm378_vm10, %v630_v23, %v631_v26  ;;  %v1685_v27 = vor.u32 %v1823_v16, %v1684_v24 }
 0x12a   : > { %v636_v14 = vsel %vm435_vm7, %v625_v12, %v635_v7  ;;  %v1825_v61 = vld [vmem:[#allocation3 + $0x54] sm:$0xf0]  ;;  %v1694_v5 = vld [vmem:[#allocation3 + $0x58] sm:$0xf0]  ;;  %v1822_v12 = vld [vmem:[#allocation3 + $0x44] sm:$0xf] }
 0x12b   : > { %v411_v28 = vsel %vm378_vm10, %v406_v30, %v407_v13  ;;  %640 = vst [vmem:[#allocation3 + $0x68] sm:$0xff] %v636_v14  ;;  %v1689_v30 = vor.u32 %v1822_v12, %v1686_v18 }
 0x12c   : > { %v412_v29 = vsel %vm409_vm12, %v401_v42, %v411_v28 }
 0x12d   : > { %416 = vst [vmem:[#allocation3 + $0x18] sm:$0xff] %v412_v29 }
 0x12e   : > { %v509_v34 = vpop.permute.xlu1 %508  ;;  %v455_v35 = vpop.permute.xlu2 %454 }
 0x12f   : > { %v516_v39 = vrot.slane %v509_v34, 4  ;;  %v462_v25 = vrot.slane %v455_v35, 4 }
 0x130   : > { %v567_v40 = vpop.permute.xlu0 %566 }
 0x131   : > { %v574_v43 = vrot.slane %v567_v40, 4  ;;  %v520_v44 = vsel %vm378_vm10, %v516_v39, %v517_v36 }
 0x132   : > { %v522_v47 = vsel %vm521_vm6, %v509_v34, %v520_v44  ;;  %v1827_v50 = vld [vmem:[#allocation3 + $0x64] sm:$0xf0]  ;;  %v1702_v51 = vld [vmem:[#allocation3 + $0x68] sm:$0xf0] }
 0x133   : > { %v578_v48 = vsel %vm378_vm10, %v574_v43, %v575_v17  ;;  %527 = vst [vmem:[#allocation3 + $0x30] sm:$0xff] %v522_v47  ;;  %v1701_v52 = vor.u32 %v1827_v50, %v1700_v33  ;;  %v1705_v60 = vor.u32 %v1826_v59, %v1702_v51 }
 0x134   : > { %v580_v42 = vsel %vm489_vm5, %v567_v40, %v578_v48 }
 0x135   : > { %585 = vst [vmem:[#allocation3 + $0x50] sm:$0xff] %v580_v42  ;;  %856 = vmatpush.bf16.msra.mxu0 %v1701_v52  ;;  %884 = vmatpush.bf16.msra.mxu2 %v1705_v60 }
 0x136   : > { %v515_v45 = vpop.permute.xlu1 %514  ;;  %v461_v56 = vpop.permute.xlu2 %460 }
 0x137   : > { %v519_v57 = vrot.slane %v515_v45, 4  ;;  %v465_v20 = vrot.slane %v461_v56, 4  ;;  %v1817_v56 = vld [vmem:[#allocation3 + $0x14] sm:$0xf0] }
 0x138   : > { %v513_v31 = vpop.permute.xlu0 %512 }
 0x139   : > { %v518_v58 = vrot.slane %v513_v31, 4 }
 0x13a   : > { %v1676_v28 = vld [vmem:[#allocation3 + $0x30] sm:$0xf]  ;;  %v1820_v29 = vld [vmem:[#allocation3 + $0x34] sm:$0xf] }
 0x13b   : > { %v523_v6 = vsel %vm378_vm10, %v518_v58, %v519_v57  ;;  %v1662_v57 = vld [vmem:[#allocation3 + $0x18] sm:$0xf0] }
 0x13c   : > { %v524_v8 = vsel %vm521_vm6, %v513_v31, %v523_v6  ;;  %v1692_v3 = vld [vmem:[#allocation3 + $0x50] sm:$0xf]  ;;  %v1824_v49 = vld [vmem:[#allocation3 + $0x54] sm:$0xf] }
 0x13d   : > { %528 = vst [vmem:[#allocation3 + $0x38] sm:$0xff] %v524_v8  ;;  %v1693_v9 = vor.u32 %v1825_v61, %v1692_v3  ;;  %v1697_v10 = vor.u32 %v1824_v49, %v1694_v5  ;;  %v1660_v8 = vld [vmem:[#allocation3 + $0x10] sm:$0xf]  ;;  %v1816_v3 = vld [vmem:[#allocation3 + $0x14] sm:$0xf] }
 0x13e   : > { %v459_v19 = vpop.permute.xlu1 %458  ;;  %v369_v26 = vpop.permute.xlu2 %368 }
 0x13f   : > { %857 = vmatpush.bf16.msra.mxu0 %v1693_v9  ;;  %885 = vmatpush.bf16.msra.mxu2 %v1697_v10  ;;  %v464_v21 = vrot.slane %v459_v19, 4  ;;  %v375_v44 = vrot.slane %v369_v26, 4  ;;  %v1661_v9 = vor.u32 %v1817_v56, %v1660_v8  ;;  %v1665_v10 = vor.u32 %v1816_v3, %v1662_v57 }
 0x140   : > { %v457_v22 = vpop.permute.xlu0 %456 }
 0x141   : > { %v463_v23 = vrot.slane %v457_v22, 4  ;;  %v469_v13 = vsel %vm378_vm10, %v464_v21, %v465_v20 }
 0x142   : > { %v470_v7 = vsel %vm467_vm4, %v459_v19, %v469_v13 }
 0x143   : > { %v466_v14 = vsel %vm378_vm10, %v462_v25, %v463_v23  ;;  %858 = vmatpush.bf16.msra.mxu0 %v1685_v27  ;;  %886 = vmatpush.bf16.msra.mxu2 %v1689_v30  ;;  %474 = vst [vmem:[#allocation3 + $0x28] sm:$0xff] %v470_v7  ;;  %v1644_v23 = vld [vmem:[%s2638_s1] sm:$0xf]  ;;  %v1813_v27 = vld [vmem:[%s2638_s1 + $0x4] sm:$0xf0] }
 0x144   : > { %v468_v34 = vsel %vm467_vm4, %v455_v35, %v466_v14  ;;  %v1821_v36 = vld [vmem:[#allocation3 + $0x34] sm:$0xf0]  ;;  %v1678_v39 = vld [vmem:[#allocation3 + $0x38] sm:$0xf0] }
 0x145   : > { %473 = vst [vmem:[#allocation3 + $0x20] sm:$0xff] %v468_v34  ;;  %v1677_v40 = vor.u32 %v1821_v36, %v1676_v28  ;;  %v1681_v17 = vor.u32 %v1820_v29, %v1678_v39  ;;  %v1645_v34 = vor.u32 %v1813_v27, %v1644_v23  ;;  %v1812_v39 = vld [vmem:[%s2638_s1 + $0x4] sm:$0xf] }
 0x146   : > { %v367_v43 = vpop.permute.xlu1 %366  ;;  %v704_v59 = vpop.permute.xlu2 %703 }
 0x147   : > { %859 = vmatpush.bf16.msra.mxu0 %v1677_v40  ;;  %887 = vmatpush.bf16.msra.mxu2 %v1681_v17  ;;  %v374_v33 = vrot.slane %v367_v43, 4  ;;  %v711_v49 = vrot.slane %v704_v59, 4  ;;  %v1646_v40 = vld [vmem:[%s2638_s1 + $0x8] sm:$0xf0] }
 0x148   : > { %v371_v47 = vpop.permute.xlu0 %370 }
 0x149   : > { %v379_v48 = vsel %vm378_vm10, %v374_v33, %v375_v44  ;;  %v376_v58 = vrot.slane %v371_v47, 4 }
 0x14a   : > { %v381_v50 = vsel %vm380_vm9, %v367_v43, %v379_v48  ;;  %v1819_v51 = vld [vmem:[#allocation3 + $0x24] sm:$0xf0]  ;;  %v1670_v42 = vld [vmem:[#allocation3 + $0x28] sm:$0xf0]  ;;  %v1649_v48 = vor.u32 %v1812_v39, %v1646_v40 }
 0x14b   : > { %386 = vst [vmem:[#allocation3] sm:$0xff] %v381_v50 }
 0x14c   : > { %v1668_v35 = vld [vmem:[#allocation3 + $0x20] sm:$0xf]  ;;  %v1818_v52 = vld [vmem:[#allocation3 + $0x24] sm:$0xf] }
 0x14d   : > { %v1669_v60 = vor.u32 %v1819_v51, %v1668_v35  ;;  %v1673_v45 = vor.u32 %v1818_v52, %v1670_v42 }
 0x14e   : > { %v373_v31 = vpop.permute.xlu1 %372  ;;  %v710_v21 = vpop.permute.xlu2 %709 }
 0x14f   : > { %860 = vmatpush.bf16.msra.mxu0 %v1669_v60  ;;  %888 = vmatpush.bf16.msra.mxu2 %v1673_v45  ;;  %v377_v6 = vrot.slane %v373_v31, 4  ;;  %v714_v24 = vrot.slane %v710_v21, 4 }
 0x150   : > { %v706_v61 = vpop.permute.xlu0 %705 }
 0x151   : > { %v712_v5 = vrot.slane %v706_v61, 4  ;;  %v382_v16 = vsel %vm378_vm10, %v376_v58, %v377_v6 }
 0x152   : > { %v383_v18 = vsel %vm380_vm9, %v371_v47, %v382_v16  ;;  %v1652_v26 = vld [vmem:[#allocation3] sm:$0xf]  ;;  %v1814_v7 = vld [vmem:[#allocation3 + $0x4] sm:$0xf] }
 0x153   : > { %v715_v19 = vsel %vm378_vm10, %v711_v49, %v712_v5  ;;  %861 = vmatpush.bf16.msra.mxu0 %v1661_v9  ;;  %889 = vmatpush.bf16.msra.mxu2 %v1665_v10  ;;  %387 = vst [vmem:[#allocation3 + $0x8] sm:$0xff] %v383_v18 }
 0x154   : > { %v717_v20 = vsel %vm347_vm8, %v704_v59, %v715_v19 }
 0x155   : > { %722 = vst [vmem:[#allocation3 + $0x80] sm:$0xff] %v717_v20 }
 0x156   : > { %v708_v22 = vpop.permute.xlu1 %707  ;;  %v917_v31 = vpop.permute.xlu2 %916 }
 0x157   : > { %v713_v12 = vrot.slane %v708_v22, 4 }
 0x158   : > { %v746_v51 = vpop.permute.xlu0 %745 }
 0x159   : > { %v718_v25 = vsel %vm378_vm10, %v713_v12, %v714_v24 }
 0x15a   : > { %v719_v30 = vsel %vm347_vm8, %v708_v22, %v718_v25  ;;  %v1815_v13 = vld [vmem:[#allocation3 + $0x4] sm:$0xf0]  ;;  %v1654_v14 = vld [vmem:[#allocation3 + $0x8] sm:$0xf0] }
 0x15b   : > { %723 = vst [vmem:[#allocation3 + $0x88] sm:$0xff] %v719_v30  ;;  %v1653_v28 = vor.u32 %v1815_v13, %v1652_v26  ;;  %v1657_v29 = vor.u32 %v1814_v7, %v1654_v14 }
 0x15c   : > { %v1716_v36 = vld [vmem:[#allocation3 + $0x80] sm:$0xf]  ;;  %v1830_v43 = vld [vmem:[#allocation3 + $0x84] sm:$0xf] }
 0x15d   : > { %862 = vmatpush.bf16.msra.mxu0 %v1653_v28  ;;  %890 = vmatpush.bf16.msra.mxu2 %v1657_v29 }
 0x15e   : > { %v750_v45 = vpop.permute.xlu1 %749 }
 0x160   : > { %891 = vmatmul.bf16.vlgmr.msra.gmra.mxu2 %v1645_v34  ;;  %863 = vmatmul.bf16.vlgmr.msra.gmra.mxu0 %v1645_v34 }
 0x162   : > { %v1831_v17 = vld [vmem:[#allocation3 + $0x84] sm:$0xf0]  ;;  %v1718_v44 = vld [vmem:[#allocation3 + $0x88] sm:$0xf0] }
 0x163   : > { %v1717_v33 = vor.u32 %v1831_v17, %v1716_v36  ;;  %v1721_v47 = vor.u32 %v1830_v43, %v1718_v44 }
 0x165   : > { %876 = vmatpush.bf16.msra.mxu1 %v1717_v33  ;;  %904 = vmatpush.bf16.msrb.mxu2 %v1721_v47 }
 0x167   : > { %v921_v19 = vpop.permute.xlu1 %920 }
 0x168   : > { %1722 = vmatmul.msk.bf16.vlgmr.msra.gmra.mxu1 %vm409_vm12, %v1649_v48 }
 0x170   : > { %1723 = vmatmul.msk.bf16.vlgmr.msrb.gmra.mxu2 %vm409_vm12, %v1649_v48 }
 0x1dd   : > { %v864_v59 = vpop.f32.mrf.mxu0 }
 0x1de   : > { %v865_v52 = vadd.f32 %v864_v59, %v746_v51 }
 0x1e3   : > { %v892_v50 = vpop.f32.mrf.mxu2 }
 0x1e4   : > { %v893_v57 = vadd.f32 %v892_v50, %v746_v51 }
 0x1e5   : > { %v878_v42 = vpop.f32.mrf.mxu1  ;;  %v866_v56 = vpop.f32.mrf.mxu0 }
 0x1e6   : > { %v879_v60 = vadd.f32 %v878_v42, %v865_v52  ;;  %v867_v61 = vadd.f32 %v866_v56, %v750_v45 }
 0x1e8   : > { %v923_v6 = vmul.f32 %v917_v31, %v879_v60  ;;  %vm911_vm13 = vcmp.gt.f32.partialorder %v879_v60, 0.0 }
 0x1ea   : > { %v927_v5 = vsel %vm911_vm13, %v879_v60, %v923_v6 }
 0x1eb   : > { %v894_v35 = vpop.f32.mrf.mxu2 }
 0x1ec   : > { %v895_v18 = vadd.f32 %v894_v35, %v750_v45 }
 0x1ed   : > { %v880_v3 = vpop.f32.mrf.mxu1 }
 0x1ee   : > { %v881_v9 = vadd.f32 %v880_v3, %v867_v61 }
 0x1f0   : > { %v925_v24 = vmul.f32 %v921_v19, %v881_v9  ;;  %vm913_vm15 = vcmp.gt.f32.partialorder %v881_v9, 0.0 }
 0x1f2   : > { %v929_v30 = vsel %vm913_vm15, %v881_v9, %v925_v24 }
 0x1f3   : > { %v906_v58 = vpop.f32.mrf.mxu2 }
 0x1f4   : > { %v907_v8 = vadd.f32 %v906_v58, %v893_v57 }
 0x1f6   : > { %vm912_vm14 = vcmp.gt.f32.partialorder %v907_v8, 0.0  ;;  %v924_v49 = vmul.f32 %v917_v31, %v907_v8 }
 0x1f8   : > { %v928_v10 = vsel %vm912_vm14, %v907_v8, %v924_v49 }
 0x1f9   : > { %v931_v16 = vpack.c.bf16 %v928_v10, %v927_v5 }
 0x1fb   : > { %933 = vst [vmem:[#allocation2 + $0x4] sm:$0xff] %v931_v16  ;;  %v908_v20 = vpop.f32.mrf.mxu2  ;;  %1195 = vrot.lane.b32.xlu2 %v931_v16, %s2081_s10  ;;  %v1103_v21 = vunpack.c.l.bf16 %v931_v16  ;;  %v1104_v22 = vunpack.c.h.bf16 %v931_v16 }
 0x1fc   : > { %v909_v12 = vadd.f32 %v908_v20, %v895_v18  ;;  %1097 = vst [vmem:[#allocation3 + $0x40] sm:$0xff] %v931_v16 }
 0x1fd   : > { %v1109_v25 = vmul.f32 %v2279_v4, %v1103_v21  ;;  %v1110_v26 = vmul.f32 %v1104_v22, %v2296_v15  ;;  %v1153_v36 = vmul.f32 %v2257_v55, %v1103_v21  ;;  %v1154_v39 = vmul.f32 %v1104_v22, %v2269_v62 }
 0x1fe   : > { %vm914_vm0 = vcmp.gt.f32.partialorder %v909_v12, 0.0  ;;  %v926_v23 = vmul.f32 %v921_v19, %v909_v12  ;;  %v1225_v17 = vmul.f32 %v2362_v32, %v1103_v21  ;;  %v1226_v43 = vmul.f32 %v1104_v22, %v2367_v41 }
 0x1ff   : > { %v1115_v27 = vpack.c.bf16 %v1110_v26, %v1109_v25  ;;  %v1159_v50 = vpack.c.bf16 %v1154_v39, %v1153_v36 }
 0x200   : > { %v930_v13 = vsel %vm914_vm0, %v909_v12, %v926_v23  ;;  %v1231_v59 = vpack.c.bf16 %v1226_v43, %v1225_v17  ;;  %v1198_v43 = vpop.permute.xlu0 %1197 }
 0x201   : > { %v932_v7 = vpack.c.bf16 %v930_v13, %v929_v30  ;;  %1123 = vrot.lane.b32.xlu1 %v1115_v27, %s2079_s28 }
 0x202   : > { %v980_v14 = vld [vmem:[#allocation2 + $0x8] sm:$0xf]  ;;  %v979_v28 = vld [vmem:[#allocation2] sm:$0xff] }
 0x203   : > { %v1052_v29 = vld [vmem:[#allocation2 + $0x8] sm:$0xf]  ;;  %934 = vst [vmem:[#allocation2 + $0x14] sm:$0xff] %v932_v7  ;;  %989 = vrot.lane.b32.xlu0 %v980_v14, %s2083_s11  ;;  %987 = vrot.lane.b32.xlu2 %v979_v28, %s2083_s11  ;;  %v1055_v47 = vunpack.c.l.bf16 %v979_v28  ;;  %v1056_v48 = vunpack.c.h.bf16 %v979_v28  ;;  %v1106_v58 = vunpack.c.l.bf16 %v932_v7  ;;  %v1107_v6 = vunpack.c.h.bf16 %v932_v7 }
 0x204   : > { %v1057_v34 = vunpack.c.l.bf16 %v1052_v29  ;;  %1098 = vst [vmem:[#allocation3 + $0x48] sm:$0xff] %v932_v7  ;;  %v1008_v44 = vld [vmem:[#allocation2 + $0x8] sm:$0xf] }
 0x205   : > { %v1013_v51 = vunpack.c.l.bf16 %v1008_v44  ;;  %v1017_v42 = vmul.f32 %v2320_v38, %v1055_v47  ;;  %v1018_v35 = vmul.f32 %v1056_v48, %v2328_v46  ;;  %v1061_v52 = vmul.f32 %v2273_v0, %v1055_v47  ;;  %v936_v13 = vld [vmem:[#allocation2 + $0x8] sm:$0xf] }
 0x206   : > { %v1063_v40 = vmul.f32 %v2271_v63, %v1057_v34  ;;  %v1062_v60 = vmul.f32 %v1056_v48, %v2288_v11  ;;  %v1112_v61 = vmul.f32 %v2279_v4, %v1106_v58  ;;  %v1113_v8 = vmul.f32 %v1107_v6, %v2296_v15 }
 0x207   : > { %v1019_v45 = vmul.f32 %v2318_v37, %v1013_v51  ;;  %v1023_v56 = vpack.c.bf16 %v1018_v35, %v1017_v42  ;;  %v1156_v3 = vmul.f32 %v2257_v55, %v1106_v58  ;;  %v1157_v49 = vmul.f32 %v1107_v6, %v2269_v62  ;;  %v1170_v51 = vpop.permute.xlu1 %1169 }
 0x208   : > { %v1068_v33 = vpack.c.bf16 %v1063_v40, %v1063_v40  ;;  %v1067_v57 = vpack.c.bf16 %v1062_v60, %v1061_v52  ;;  %v1117_v9 = vpack.c.bf16 %v1113_v8, %v1112_v61  ;;  %v945_v19 = vmul.f32 %v2337_v54, %v1055_v47 }
 0x209   : > { %v1024_v31 = vpack.c.bf16 %v1019_v45, %v1019_v45  ;;  %v1161_v10 = vpack.c.bf16 %v1157_v49, %v1156_v3  ;;  %v946_v4 = vmul.f32 %v1056_v48, %v2343_v2  ;;  %v1228_v24 = vmul.f32 %v2362_v32, %v1106_v58 }
 0x20a   : > { %1077 = vrot.lane.b32.xlu1 %v1068_v33, %s2077_s26  ;;  %v981_v5 = vld [vmem:[#allocation2 + $0x10] sm:$0xff]  ;;  %v1054_v62 = vld [vmem:[#allocation2 + $0x18] sm:$0xf]  ;;  %v1229_v12 = vmul.f32 %v1107_v6, %v2367_v41  ;;  %v941_v29 = vunpack.c.l.bf16 %v936_v13  ;;  %v1204_v44 = vrot.slane %v1198_v43, 4 }
 0x20b   : > { %1167 = vrot.lane.b32.xlu0 %v1159_v50, %s2078_s8  ;;  %1239 = vrot.lane.b32.xlu2 %v1231_v59, %s2080_s9  ;;  %v1058_v16 = vunpack.c.l.bf16 %v981_v5  ;;  %v1059_v18 = vunpack.c.h.bf16 %v981_v5  ;;  %v951_v20 = vpack.c.bf16 %v946_v4, %v945_v19  ;;  %v1060_v21 = vunpack.c.l.bf16 %v1054_v62  ;;  %v1010_v25 = vld [vmem:[#allocation2 + $0x18] sm:$0xf]  ;;  %v1174_v50 = vpop.permute.xlu0 %1173 }
 0x20c   : > { %v1016_v23 = vunpack.c.l.bf16 %v1010_v25  ;;  %v982_v27 = vld [vmem:[#allocation2 + $0x18] sm:$0xf]  ;;  %v1178_v8 = vrot.slane %v1174_v50, 4 }
 0x20d   : > { %v1064_v15 = vmul.f32 %v2273_v0, %v1058_v16  ;;  %v1065_v55 = vmul.f32 %v1059_v18, %v2288_v11  ;;  %v1066_v26 = vmul.f32 %v2271_v63, %v1060_v21  ;;  %v1233_v0 = vpack.c.bf16 %v1229_v12, %v1228_v24  ;;  %v938_v14 = vld [vmem:[#allocation2 + $0x18] sm:$0xf] }
 0x20e   : > { %v1022_v30 = vmul.f32 %v2318_v37, %v1016_v23  ;;  %v1020_v32 = vmul.f32 %v2320_v38, %v1058_v16  ;;  %v1021_v41 = vmul.f32 %v1059_v18, %v2328_v46  ;;  %v949_v63 = vmul.f32 %v1059_v18, %v2343_v2 }
 0x20f   : > { %v1069_v22 = vpack.c.bf16 %v1065_v55, %v1064_v15  ;;  %v1070_v11 = vpack.c.bf16 %v1066_v26, %v1066_v26  ;;  %v944_v36 = vunpack.c.l.bf16 %v938_v14  ;;  %v947_v37 = vmul.f32 %v2335_v53, %v941_v29 }
 0x210   : > { %v1026_v28 = vpack.c.bf16 %v1022_v30, %v1022_v30  ;;  %v1025_v34 = vpack.c.bf16 %v1021_v41, %v1020_v32  ;;  %v1176_v21 = vrot.slane %v1170_v51, 4 }
 0x211   : > { %v950_v38 = vmul.f32 %v2335_v53, %v944_v36  ;;  %v952_v46 = vpack.c.bf16 %v947_v37, %v947_v37 }
 0x212   : > { %1031 = vrot.lane.b32.xlu1 %v1023_v56, %s2076_s29 }
 0x213   : > { %1075 = vrot.lane.b32.xlu0 %v1067_v57, %s2077_s26  ;;  %1033 = vrot.lane.b32.xlu2 %v1024_v31, %s2076_s29  ;;  %v954_v2 = vpack.c.bf16 %v950_v38, %v950_v38  ;;  %v1242_v42 = vpop.permute.xlu0 %1241  ;;  %v1130_v57 = vpop.permute.xlu1 %1129 }
 0x214   : > { %v1248_v52 = vrot.slane %v1242_v42, 4 }
 0x21a   : > { %1199 = vrot.lane.b32.xlu1 %v932_v7, %s2081_s10  ;;  %v948_v7 = vmul.f32 %v2337_v54, %v1058_v16  ;;  %v2507_v54 = vpop.permute.xlu2 %1201 }
 0x21b   : > { %1127 = vrot.lane.b32.xlu0 %v1117_v9, %s2079_s28  ;;  %1171 = vrot.lane.b32.xlu2 %v1161_v10, %s2078_s8  ;;  %v1206_v14 = vrot.slane %v2507_v54, 4 }
 0x21c   : > { %v953_v39 = vpack.c.bf16 %v949_v63, %v948_v7 }
 0x222   : > { %991 = vrot.lane.b32.xlu1 %v981_v5, %s2083_s11  ;;  %v1126_v40 = vpop.permute.xlu2 %1125 }
 0x223   : > { %959 = vrot.lane.b32.xlu0 %v951_v20, %s2082_s7  ;;  %1079 = vrot.lane.b32.xlu2 %v1069_v22, %s2077_s26  ;;  %v1132_v6 = vrot.slane %v1126_v40, 4 }
 0x22a   : > { %1243 = vrot.lane.b32.xlu1 %v1233_v0, %s2080_s9  ;;  %v2511_v17 = vpop.permute.xlu2 %1245  ;;  %s2023_s9 = scalar_lea.hbm %s2642_s5, 64 }
 0x22b   : > { %1081 = vrot.lane.b32.xlu0 %v1070_v11, %s2077_s26  ;;  %993 = vrot.lane.b32.xlu2 %v982_v27, %s2083_s11 }
 0x232   : > { %1037 = vrot.lane.b32.xlu1 %v1026_v28, %s2076_s29 }
 0x233   : > { %1035 = vrot.lane.b32.xlu0 %v1025_v34, %s2076_s29  ;;  %963 = vrot.lane.b32.xlu2 %v953_v39, %s2082_s7  ;;  %v1134_v34 = vrot.slane %v1130_v57, 4 }
 0x23a   : > { %961 = vrot.lane.b32.xlu1 %v952_v46, %s2082_s7 }
 0x23b   : > { %965 = vrot.lane.b32.xlu0 %v954_v2, %s2082_s7  ;;  %s244_s7 = scalar_lea.vmem [#allocation7], %s1636_s14 }
 0x23c   : > { %s1553_s13 = sshll.u32 %s244_s7, 4  ;;  %s1554_s13 = int_to_ptr.vmem [resolvable:$true] %s1553_s13 }
 0x255   : > { %v1196_v33 = vpop.permute.xlu2 %1195 }
 0x256   : > { %v1203_v47 = vrot.slane %v1196_v33, 4 }
 0x258   : > { %v1207_v48 = vsel %vm378_vm10, %v1203_v47, %v1204_v44 }
 0x259   : > { %v1208_v53 = vsel %vm662_vm11, %v1196_v33, %v1207_v48 }
 0x25a   : > { %1213 = vst [vmem:[#allocation3 + $0x70] sm:$0xff] %v1208_v53 }
 0x25d   : > { %v988_v59 = vpop.permute.xlu2 %987 }
 0x25e   : > { %v995_v5 = vrot.slane %v988_v59, 4 }
 0x261   : > { %v1790_v48 = vld [vmem:[#allocation3 + $0x70] sm:$0xf] }
 0x265   : > { %v1240_v35 = vpop.permute.xlu2 %1239 }
 0x266   : > { %v1247_v60 = vrot.slane %v1240_v35, 4 }
 0x268   : > { %v1251_v45 = vsel %vm378_vm10, %v1247_v60, %v1248_v52 }
 0x269   : > { %v1252_v56 = vsel %vm347_vm8, %v1240_v35, %v1251_v45  ;;  %v1250_v35 = vrot.slane %v2511_v17, 4 }
 0x26a   : > { %1257 = vst [vmem:[#allocation3 + $0x80] sm:$0xff] %v1252_v56 }
 0x26d   : > { %v1034_v31 = vpop.permute.xlu2 %1033 }
 0x26e   : > { %v1040_v26 = vrot.slane %v1034_v31, 4 }
 0x273   : > { %v1124_v58 = vpop.permute.xlu1 %1123 }
 0x274   : > { %v1131_v61 = vrot.slane %v1124_v58, 4 }
 0x275   : > { %v990_v3 = vpop.permute.xlu0 %989  ;;  %v1172_v49 = vpop.permute.xlu2 %1171 }
 0x276   : > { %v996_v9 = vrot.slane %v990_v3, 4  ;;  %v1135_v10 = vsel %vm378_vm10, %v1131_v61, %v1132_v6  ;;  %v1177_v16 = vrot.slane %v1172_v49, 4 }
 0x277   : > { %v1136_v18 = vsel %vm489_vm5, %v1124_v58, %v1135_v10 }
 0x278   : > { %v999_v19 = vsel %vm378_vm10, %v995_v5, %v996_v9  ;;  %1141 = vst [vmem:[#allocation3 + $0x50] sm:$0xff] %v1136_v18  ;;  %v1181_v4 = vsel %vm378_vm10, %v1177_v16, %v1178_v8  ;;  %v1843_v5 = vld [vmem:[#allocation3 + $0x44] sm:$0xf0]  ;;  %v1766_v9 = vld [vmem:[#allocation3 + $0x40] sm:$0xf] }
 0x279   : > { %v1000_v15 = vsel %vm409_vm12, %v988_v59, %v999_v19  ;;  %v1182_v55 = vsel %vm435_vm7, %v1172_v49, %v1181_v4  ;;  %v1767_v10 = vor.u32 %v1843_v5, %v1766_v9  ;;  %v1798_v18 = vld [vmem:[#allocation3 + $0x80] sm:$0xf]  ;;  %v1850_v19 = vld [vmem:[#allocation3 + $0x84] sm:$0xf] }
 0x27a   : > { %1005 = vst [vmem:[#allocation3 + $0x10] sm:$0xff] %v1000_v15  ;;  %v1832_v4 = vld [vmem:[%s2639_s2 + $0x4] sm:$0xf] }
 0x27b   : > { %1186 = vst [vmem:[#allocation3 + $0x68] sm:$0xff] %v1182_v55 }
 0x27c   : > { %v1078_v62 = vpop.permute.xlu1 %1077 }
 0x27d   : > { %v1168_v20 = vpop.permute.xlu0 %1167  ;;  %v1084_v11 = vrot.slane %v1078_v62, 4  ;;  %v1080_v13 = vpop.permute.xlu2 %1079 }
 0x27e   : > { %v1175_v22 = vrot.slane %v1168_v20, 4  ;;  %v1085_v57 = vrot.slane %v1080_v13, 4 }
 0x27f   : > { %v1774_v61 = vld [vmem:[#allocation3 + $0x50] sm:$0xf] }
 0x280   : > { %v1179_v24 = vsel %vm378_vm10, %v1175_v22, %v1176_v21 }
 0x281   : > { %v1180_v12 = vsel %vm435_vm7, %v1168_v20, %v1179_v24  ;;  %v1728_v20 = vld [vmem:[%s2639_s2 + $0x8] sm:$0xf0]  ;;  %v1836_v9 = vld [vmem:[#allocation3 + $0x14] sm:$0xf] }
 0x282   : > { %1185 = vst [vmem:[#allocation3 + $0x60] sm:$0xff] %v1180_v12  ;;  %v1847_v42 = vld [vmem:[#allocation3 + $0x64] sm:$0xf0] }
 0x284   : > { %v1032_v25 = vpop.permute.xlu1 %1031 }
 0x285   : > { %v1039_v0 = vrot.slane %v1032_v25, 4  ;;  %v1076_v23 = vpop.permute.xlu0 %1075  ;;  %v994_v2 = vpop.permute.xlu2 %993 }
 0x286   : > { %v1083_v27 = vrot.slane %v1076_v23, 4  ;;  %v998_v43 = vrot.slane %v994_v2, 4 }
 0x287   : > { %v1043_v30 = vsel %vm378_vm10, %v1039_v0, %v1040_v26  ;;  %v1848_v26 = vld [vmem:[#allocation3 + $0x74] sm:$0xf]  ;;  %v2086_v0 = vmov 4  }
 0x288   : > { %v1044_v32 = vsel %vm467_vm4, %v1032_v25, %v1043_v30  ;;  %v1087_v41 = vsel %vm378_vm10, %v1083_v27, %v1084_v11  ;;  %1953 = vset.pattern.permute.xlu1 %v2086_v0  ;;  %1954 = vset.pattern.permute.xlu2 %v2086_v0 }
 0x289   : > { %1049 = vst [vmem:[#allocation3 + $0x20] sm:$0xff] %v1044_v32  ;;  %v1088_v7 = vsel %vm521_vm6, %v1076_v23, %v1087_v41  ;;  %v1782_v59 = vld [vmem:[#allocation3 + $0x60] sm:$0xf]  ;;  %v1968_v41 = vld [vmem:[%s2640_s3 + $0x8] sm:$0xff] }
 0x28a   : > { %1093 = vst [vmem:[#allocation3 + $0x30] sm:$0xff] %v1088_v7  ;;  %v1783_v60 = vor.u32 %v1847_v42, %v1782_v59  ;;  %v1967_v32 = vld [vmem:[%s2640_s3] sm:$0xff]  ;;  %1284 = vperm.xlu2 %1954, %v1968_v41  }
 0x28b   : > { %1280 = vperm.xlu1 %1953, %v1967_v32  }
 0x28c   : > { %v1200_v63 = vpop.permute.xlu1 %1199 }
 0x28d   : > { %v1205_v28 = vrot.slane %v1200_v63, 4  ;;  %v1128_v29 = vpop.permute.xlu0 %1127 }
 0x28e   : > { %v1133_v36 = vrot.slane %v1128_v29, 4 }
 0x28f   : > { %v1209_v39 = vsel %vm378_vm10, %v1205_v28, %v1206_v14  ;;  %v964_v14 = vpop.permute.xlu2 %963 }
 0x290   : > { %v1210_v37 = vsel %vm662_vm11, %v1200_v63, %v1209_v39  ;;  %v1137_v38 = vsel %vm378_vm10, %v1133_v36, %v1134_v34  ;;  %v1846_v63 = vld [vmem:[#allocation3 + $0x64] sm:$0xf]  ;;  %v1784_v36 = vld [vmem:[#allocation3 + $0x68] sm:$0xf0] }
 0x291   : > { %1214 = vst [vmem:[#allocation3 + $0x78] sm:$0xff] %v1210_v37  ;;  %v1138_v46 = vsel %vm489_vm5, %v1128_v29, %v1137_v38  ;;  %v1758_v11 = vld [vmem:[#allocation3 + $0x30] sm:$0xf]  ;;  %v1787_v37 = vor.u32 %v1846_v63, %v1784_v36  ;;  %v969_v38 = vrot.slane %v964_v14, 4  ;;  %v2087_v63 = vmov 256.0  }
 0x292   : > { %1142 = vst [vmem:[#allocation3 + $0x58] sm:$0xff] %v1138_v46  ;;  %1955 = vset.pattern.permute.xlu2 %v2073_v1  ;;  %v1833_v1 = vld [vmem:[%s2639_s2 + $0x4] sm:$0xf0]  ;;  %1957 = vrcp.f32 %v2087_v63 }
 0x294   : > { %v992_v40 = vpop.permute.xlu1 %991 }
 0x295   : > { %v997_v44 = vrot.slane %v992_v40, 4  ;;  %v2534_v33 = vpop.permute.xlu0 %959 }
 0x296   : > { %v967_v29 = vrot.slane %v2534_v33, 4 }
 0x297   : > { %v1001_v54 = vsel %vm378_vm10, %v997_v44, %v998_v43 }
 0x298   : > { %v1002_v47 = vsel %vm409_vm12, %v992_v40, %v1001_v54  ;;  %v1849_v50 = vld [vmem:[#allocation3 + $0x74] sm:$0xf0]  ;;  %v1792_v62 = vld [vmem:[#allocation3 + $0x78] sm:$0xf0]  ;;  %v1844_v54 = vld [vmem:[#allocation3 + $0x54] sm:$0xf] }
 0x299   : > { %1006 = vst [vmem:[#allocation3 + $0x18] sm:$0xff] %v1002_v47  ;;  %v1791_v53 = vor.u32 %v1849_v50, %v1790_v48  ;;  %v1845_v56 = vld [vmem:[#allocation3 + $0x54] sm:$0xf0]  ;;  %v1795_v30 = vor.u32 %v1848_v26, %v1792_v62  ;;  %v1776_v40 = vld [vmem:[#allocation3 + $0x58] sm:$0xf0] }
 0x29a   : > { %v1775_v3 = vor.u32 %v1845_v56, %v1774_v61  ;;  %v1750_v48 = vld [vmem:[#allocation3 + $0x20] sm:$0xf]  ;;  %v1840_v56 = vld [vmem:[#allocation3 + $0x34] sm:$0xf] }
 0x29b   : > { %1389 = vmatpush.bf16.msrb.mxu1 %v1791_v53  ;;  %v1779_v53 = vor.u32 %v1844_v54, %v1776_v40 }
 0x29c   : > { %v1244_v51 = vpop.permute.xlu1 %1243 }
 0x29d   : > { %v1249_v52 = vrot.slane %v1244_v51, 4  ;;  %v1082_v45 = vpop.permute.xlu0 %1081 }
 0x29e   : > { %v1086_v31 = vrot.slane %v1082_v45, 4 }
 0x29f   : > { %v1253_v58 = vsel %vm378_vm10, %v1249_v52, %v1250_v35  ;;  %1390 = vmatpush.bf16.msrb.mxu1 %v1783_v60  ;;  %v1842_v35 = vld [vmem:[#allocation3 + $0x44] sm:$0xf] }
 0x2a0   : > { %v1254_v6 = vsel %vm347_vm8, %v1244_v51, %v1253_v58  ;;  %v1089_v8 = vsel %vm378_vm10, %v1085_v57, %v1086_v31  ;;  %v1768_v51 = vld [vmem:[#allocation3 + $0x48] sm:$0xf0]  ;;  %v1837_v42 = vld [vmem:[#allocation3 + $0x14] sm:$0xf0]  ;;  %v1726_v57 = vld [vmem:[%s2639_s2] sm:$0xf] }
 0x2a1   : > { %1258 = vst [vmem:[#allocation3 + $0x88] sm:$0xff] %v1254_v6  ;;  %v1090_v49 = vsel %vm521_vm6, %v1080_v13, %v1089_v8  ;;  %v1731_v13 = vor.u32 %v1832_v4, %v1728_v20  ;;  %v1771_v52 = vor.u32 %v1842_v35, %v1768_v51 }
 0x2a2   : > { %1094 = vst [vmem:[#allocation3 + $0x38] sm:$0xff] %v1090_v49  ;;  %v1838_v49 = vld [vmem:[#allocation3 + $0x24] sm:$0xf] }
 0x2a3   : > { %1391 = vmatpush.bf16.msrb.mxu1 %v1775_v3  ;;  %v1727_v3 = vor.u32 %v1833_v1, %v1726_v57 }
 0x2a4   : > { %v1038_v17 = vpop.permute.xlu1 %1037 }
 0x2a5   : > { %v1036_v16 = vpop.permute.xlu0 %1035  ;;  %v1042_v55 = vrot.slane %v1038_v17, 4  ;;  %v1744_v17 = vld [vmem:[#allocation3 + $0x18] sm:$0xf0] }
 0x2a6   : > { %v1041_v15 = vrot.slane %v1036_v16, 4 }
 0x2a7   : > { %1392 = vmatpush.bf16.msrb.mxu1 %v1767_v10  ;;  %v1747_v10 = vor.u32 %v1836_v9, %v1744_v17 }
 0x2a8   : > { %v1851_v21 = vld [vmem:[#allocation3 + $0x84] sm:$0xf0]  ;;  %v1800_v22 = vld [vmem:[#allocation3 + $0x88] sm:$0xf0]  ;;  %v1045_v24 = vsel %vm378_vm10, %v1041_v15, %v1042_v55 }
 0x2a9   : > { %v1799_v12 = vor.u32 %v1851_v21, %v1798_v18  ;;  %v1803_v25 = vor.u32 %v1850_v19, %v1800_v22  ;;  %v1046_v23 = vsel %vm467_vm4, %v1036_v16, %v1045_v24  ;;  %v1841_v27 = vld [vmem:[#allocation3 + $0x34] sm:$0xf0]  ;;  %v1760_v45 = vld [vmem:[#allocation3 + $0x38] sm:$0xf0] }
 0x2aa   : > { %1050 = vst [vmem:[#allocation3 + $0x28] sm:$0xff] %v1046_v23  ;;  %v1759_v7 = vor.u32 %v1841_v27, %v1758_v11  ;;  %v1763_v6 = vor.u32 %v1840_v56, %v1760_v45 }
 0x2ab   : > { %1410 = vmatpush.bf16.msra.mxu3 %v1799_v12  ;;  %1438 = vmatpush.bf16.msrb.mxu0 %v1803_v25 }
 0x2ac   : > { %v962_v28 = vpop.permute.xlu1 %961  ;;  %1393 = vmatpush.bf16.msrb.mxu1 %v1759_v7 }
 0x2ad   : > { %v968_v34 = vrot.slane %v962_v28, 4  ;;  %v966_v39 = vpop.permute.xlu0 %965 }
 0x2ae   : > { %1804 = vmatmul.msk.bf16.vlgmr.msra.gmra.mxu3 %vm409_vm12, %v1731_v13  ;;  %1805 = vmatmul.msk.bf16.vlgmr.msrb.gmra.mxu0 %vm409_vm12, %v1731_v13  ;;  %v970_v46 = vrot.slane %v966_v39, 4 }
 0x2af   : > { %1417 = vmatpush.bf16.msrb.mxu3 %v1795_v30  ;;  %v971_v2 = vsel %vm378_vm10, %v967_v29, %v968_v34 }
 0x2b0   : > { %v972_v43 = vsel %vm380_vm9, %v2534_v33, %v971_v2  ;;  %v973_v44 = vsel %vm378_vm10, %v969_v38, %v970_v46  ;;  %v1742_v33 = vld [vmem:[#allocation3 + $0x10] sm:$0xf]  ;;  %v252_v46 = vld [vmem:[%s2641_s4] sm:$0xff]  ;;  %v253_v2 = vld [vmem:[%s2641_s4 + $0x8] sm:$0xff] }
 0x2b1   : > { %977 = vst [vmem:[#allocation3] sm:$0xff] %v972_v43  ;;  %v974_v47 = vsel %vm380_vm9, %v964_v14, %v973_v44  ;;  %v1839_v50 = vld [vmem:[#allocation3 + $0x24] sm:$0xf0]  ;;  %v1743_v60 = vor.u32 %v1837_v42, %v1742_v33  ;;  %v1752_v8 = vld [vmem:[#allocation3 + $0x28] sm:$0xf0]  ;;  %v1958_v14 = vpop.eup %1957 }
 0x2b2   : > { %978 = vst [vmem:[#allocation3 + $0x8] sm:$0xff] %v974_v47  ;;  %v1751_v59 = vor.u32 %v1839_v50, %v1750_v48  ;;  %v1755_v5 = vor.u32 %v1838_v49, %v1752_v8  ;;  %v1452_v28 = vmul.f32 256.0, %v1958_v14  ;;  %vm1456_vm1 = vweird.f32 %v1958_v14 }
 0x2b3   : > { %1418 = vmatpush.bf16.msrb.mxu3 %v1787_v37 }
 0x2b4   : > { %1394 = vmatpush.bf16.msrb.mxu1 %v1751_v59  ;;  %v1453_v29 = vsub.f32 1.0, %v1452_v28 }
 0x2b6   : > { %v1454_v34 = vmul.f32 %v1958_v14, %v1453_v29 }
 0x2b7   : > { %1419 = vmatpush.bf16.msrb.mxu3 %v1779_v53 }
 0x2b8   : > { %1395 = vmatpush.bf16.msrb.mxu1 %v1743_v60  ;;  %v1734_v31 = vld [vmem:[#allocation3] sm:$0xf]  ;;  %v1834_v18 = vld [vmem:[#allocation3 + $0x4] sm:$0xf]  ;;  %v1455_v36 = vadd.f32 %v1958_v14, %v1454_v34 }
 0x2b9   : > { %v1835_v58 = vld [vmem:[#allocation3 + $0x4] sm:$0xf0]  ;;  %v1736_v16 = vld [vmem:[#allocation3 + $0x8] sm:$0xf0]  ;;  %v1971_v34 = vld [vmem:[%s2211_s25 + $0x10] sm:$0xff] }
 0x2ba   : > { %v1735_v61 = vor.u32 %v1835_v58, %v1734_v31  ;;  %v1739_v19 = vor.u32 %v1834_v18, %v1736_v16  ;;  %v1457_v39 = vsel %vm1456_vm1, %v1958_v14, %v1455_v36  ;;  %v1970_v14 = vld [vmem:[%s2211_s25 + $0x8] sm:$0xff] }
 0x2bb   : > { %1420 = vmatpush.bf16.msrb.mxu3 %v1771_v52 }
 0x2bc   : > { %1396 = vmatpush.bf16.msrb.mxu1 %v1735_v61 }
 0x2bf   : > { %1421 = vmatpush.bf16.msrb.mxu3 %v1763_v6  ;;  %1397 = vmatmul.bf16.vlgmr.msrb.gmra.mxu1 %v1727_v3 }
 0x2c3   : > { %1422 = vmatpush.bf16.msrb.mxu3 %v1755_v5 }
 0x2c7   : > { %1423 = vmatpush.bf16.msrb.mxu3 %v1747_v10 }
 0x2cb   : > { %1424 = vmatpush.bf16.msrb.mxu3 %v1739_v19 }
 0x2ce   : > { %1425 = vmatmul.bf16.vlgmr.msrb.gmra.mxu3 %v1727_v3 }
 0x2e4   : > { %v1285_v26 = vpop.permute.xlu2 %1284 }
 0x2fd   : > { %v1281_v62 = vpop.permute.xlu1 %1280 }
 0x32b   : > { %v1440_v21 = vpop.f32.mrf.mxu0 }
 0x331   : > { %v1412_v4 = vpop.f32.mrf.mxu3 }
 0x333   : > { %v1442_v13 = vpop.f32.mrf.mxu0 }
 0x339   : > { %v1414_v15 = vpop.f32.mrf.mxu3 }
 0x33c   : > { %v1398_v55 = vpop.f32.mrf.mxu1 }
 0x33d   : > { %v1399_v20 = vadd.f32 %v1398_v55, %v1281_v62 }
 0x33f   : > { %v2574_v25 = vadd.f32 %v1412_v4, %v1399_v20 }
 0x344   : > { %v1400_v0 = vpop.f32.mrf.mxu1 }
 0x345   : > { %v1401_v11 = vadd.f32 %v1400_v0, %v1285_v26 }
 0x347   : > { %v2578_v32 = vadd.f32 %v1414_v15, %v1401_v11 }
 0x351   : > { %v1426_v22 = vpop.f32.mrf.mxu3 }
 0x352   : > { %v1427_v24 = vadd.f32 %v1426_v22, %v1281_v62 }
 0x354   : > { %v2572_v12 = vadd.f32 %v1440_v21, %v1427_v24 }
 0x356   : > { %v1445_v23 = vadd.f32 %v2572_v12, %v2574_v25 }
 0x358   : > { %1446 = vadd.xlane.f32.xlu0 %v1445_v23 }
 0x359   : > { %v1428_v27 = vpop.f32.mrf.mxu3 }
 0x35a   : > { %v1429_v30 = vadd.f32 %v1428_v27, %v1285_v26 }
 0x35c   : > { %v2580_v41 = vadd.f32 %v1442_v13, %v1429_v30 }
 0x35e   : > { %v1448_v7 = vadd.f32 %v2580_v41, %v2578_v32 }
 0x360   : > { %1449 = vadd.xlane.f32.xlu1 %v1448_v7  ;;  %v1969_v7 = vld [vmem:[%s2211_s25] sm:$0xff] }
 0x3cb   : > { %v1447_v37 = vpop.xlane.xlu0 %1446 }
 0x3cc   : > { %v1458_v38 = vmul.f32 %v1457_v39, %v1447_v37 }
 0x3ce   : > { %v1460_v43 = vmul.f32 %v1458_v38, %v252_v46 }
 0x3d0   : > { %v1462_v47 = vsel %vm521_vm6, %v1460_v43, 0.0 }
 0x3d3   : > { %v1450_v40 = vpop.xlane.xlu1 %1449 }
 0x3d4   : > { %v1459_v44 = vmul.f32 %v1457_v39, %v1450_v40  ;;  %v1972_v39 = vld [vmem:[%s2211_s25 + $0x18] sm:$0xff] }
 0x3d6   : > { %v1461_v54 = vmul.f32 %v1459_v44, %v253_v2 }
 0x3d8   : > { %v1463_v48 = vsel %vm521_vm6, %v1461_v54, 0.0 }
 0x3d9   : > { %v1464_v50 = vadd.f32 %v1463_v48, %v1462_v47 }
 0x3db   : > { %v1465_v53 = vrot.slane %v1464_v50, 4 }
 0x3dd   : > { %v1466_v59 = vadd.f32 %v1465_v53, %v1464_v50 }
 0x3df   : > { %v1467_v51 = vrot.slane %v1466_v59, 2 }
 0x3e1   : > { %v1468_v42 = vadd.f32 %v1467_v51, %v1466_v59 }
 0x3e3   : > { %v1469_v35 = vrot.slane %v1468_v42, 1 }
 0x3e5   : > { %v1470_v33 = vadd.f32 %v1469_v35, %v1468_v42 }
 0x3e7   : > { %v1471_v52 = vmax.f32 %v1470_v33, 0.0 }
 0x3e9   : > { %1473 = vrot.lane.b32.xlu2 %v1471_v52, %s2077_s26  ;;  %s1852_s26 = sshll.u32 %s2140_s22, 5  ;;  %s1541_s22 = scalar_lea.sflag [#allocation6], %s2205_s12 }
 0x3ea   : > { %s1552_s23 = scalar_lea.hbm %s2642_s5, %s1852_s26 }
 0x3eb   : > { %s1555_s15 = sshll.u32 %s1552_s23, 4  ;;  %s1556_s15 = int_to_ptr.hbm [resolvable:$true] %s1555_s15 }
 0x3ec   : > { %s2017_s14 = sshra.s32 %s1556_s15, 4  ;;  %s2018_s14 = int_to_ptr.hbm [resolvable:$true] %s2017_s14 }
 0x3ed   : > { %s2019_s29 = scalar_lea.hbm %s2018_s14, 32  ;;  %p2024_p0 = scmp.lt.s32.totalorder %s2018_s14, %s2642_s5 }
 0x3ee   : > { %p2020_p6 = scmp.ne.s32.totalorder %s2018_s14, %s2019_s29  ;;  %p2025_p1 = scmp.lt.s32.totalorder %s2023_s9, %s2019_s29 }
 0x3f0   : > { %p2021_p9 = pnand %p2020_p6, %p2169_p11  ;;  %p2026_p3 = por %p2025_p1, %p2024_p0 }
 0x3f2   : > { %p2022_p13 = pneg %p2021_p9 }
 0x3f4   : > { %p2027_p4 = pnand %p2026_p3, %p2022_p13 }
 0x443   : > { %v1474_v60 = vpop.permute.xlu2 %1473 }
 0x444   : > { %v1476_v45 = vmul.f32 %v1474_v60, %v252_v46  ;;  %v1477_v56 = vmul.f32 %v1474_v60, %v253_v2 }
 0x446   : > { %v1480_v57 = vsub.f32 0.0, %v1476_v45  ;;  %v1481_v1 = vsub.f32 0.0, %v1477_v56 }
 0x448   : > { %v1482_v31 = vmul.f32 1.442695, %v1480_v57  ;;  %v1484_v58 = vmul.f32 1.442695, %v1481_v1 }
 0x44a   : > { %1959 = vpow2.f32 %v1482_v31 }
 0x44b   : > { %1961 = vpow2.f32 %v1484_v58 }
 0x450   : > { %v1960_v6 = vpop.eup %1959 }
 0x451   : > { %v1962_v61 = vpop.eup %1961  ;;  %v1486_v8 = vadd.f32 1.0, %v1960_v6 }
 0x452   : > { %v1487_v3 = vadd.f32 1.0, %v1962_v61 }
 0x453   : > { %1963 = vrcp.f32 %v1486_v8  ;;  %v1499_v16 = vand.u32 2147483648, %v1486_v8  ;;  %v1497_v4 = vand.u32 2147483647, %v1486_v8  ;;  %vm1493_vm3 = vweird.f32 %v1486_v8 }
 0x454   : > { %1965 = vrcp.f32 %v1487_v3  ;;  %v1514_v24 = vand.u32 2147483648, %v1487_v3  ;;  %vm1508_vm7 = vweird.f32 %v1487_v3  ;;  %v1512_v26 = vand.u32 2147483647, %v1487_v3 }
 0x455   : > { %v1500_v62 = vor.u32 1.1754944e-38, %v1499_v16  ;;  %vm1498_vm5 = vcmp.eq.f32.partialorder %v1497_v4, 8.507059e+37 }
 0x456   : > { %v1515_v23 = vor.u32 1.1754944e-38, %v1514_v24  ;;  %vm1513_vm9 = vcmp.eq.f32.partialorder %v1512_v26, 8.507059e+37 }
 0x459   : > { %v1964_v49 = vpop.eup %1963 }
 0x45a   : > { %v1966_v5 = vpop.eup %1965  ;;  %v1489_v17 = vmul.f32 %v1964_v49, %v1486_v8  ;;  %vm1494_vm2 = vweird.f32 %v1964_v49 }
 0x45b   : > { %v1504_v9 = vmul.f32 %v1966_v5, %v1487_v3  ;;  %vm1495_vm4 = vmor %vm1493_vm3, %vm1494_vm2  ;;  %vm1509_vm6 = vweird.f32 %v1966_v5 }
 0x45c   : > { %v1490_v10 = vsub.f32 1.0, %v1489_v17  ;;  %vm1510_vm8 = vmor %vm1508_vm7, %vm1509_vm6 }
 0x45d   : > { %v1505_v18 = vsub.f32 1.0, %v1504_v9 }
 0x45e   : > { %v1491_v19 = vmul.f32 %v1964_v49, %v1490_v10 }
 0x45f   : > { %v1506_v55 = vmul.f32 %v1966_v5, %v1505_v18 }
 0x460   : > { %v1492_v15 = vadd.f32 %v1964_v49, %v1491_v19 }
 0x461   : > { %v1507_v22 = vadd.f32 %v1966_v5, %v1506_v55 }
 0x462   : > { %v1496_v20 = vsel %vm1495_vm4, %v1964_v49, %v1492_v15 }
 0x463   : > { %v1501_v21 = vsel %vm1498_vm5, %v1500_v62, %v1496_v20  ;;  %v1511_v0 = vsel %vm1510_vm8, %v1966_v5, %v1507_v22 }
 0x464   : > { %1520 = vperm.xlu2 %1955, %v1501_v21   ;;  %v1516_v11 = vsel %vm1513_vm9, %v1515_v23, %v1511_v0 }
 0x46c   : > { %1525 = vperm.xlu2 %1955, %v1516_v11  }
 0x4be   : > { %v1521_v27 = vpop.permute.xlu2 %1520 }
 0x4bf   : > { %v1528_v30 = vmul.f32 %v1521_v27, %v2574_v25  ;;  %v1529_v13 = vmul.f32 %v1521_v27, %v2572_v12 }
 0x4c1   : > { %v1532_v63 = vadd.f32 %v1969_v7, %v1528_v30  ;;  %v1533_v28 = vadd.f32 %v1970_v14, %v1529_v13 }
 0x4c3   : > { %1536 = vst [vmem:[%s244_s7] sm:$0xff] %v1532_v63 }
 0x4c4   : > { %1537 = vst [vmem:[%s244_s7 + $0x8] sm:$0xff] %v1533_v28 }
 0x4c6   : > { %v1526_v25 = vpop.permute.xlu2 %1525 }
 0x4c7   : > { %v1530_v12 = vmul.f32 %v1526_v25, %v2578_v32  ;;  %v1531_v29 = vmul.f32 %v1526_v25, %v2580_v41 }
 0x4c9   : > { %v1534_v36 = vadd.f32 %v1971_v34, %v1530_v12  ;;  %v1535_v37 = vadd.f32 %v1972_v39, %v1531_v29 }
 0x4cb   : > { %1538 = vst [vmem:[%s244_s7 + $0x10] sm:$0xff] %v1534_v36 }
 0x4cc   : > { %1539 = vst [vmem:[%s244_s7 + $0x18] sm:$0xff] %v1535_v37 }
 0x4cd   : > { %2030 = shalt.err (!%p2027_p4)
}
 0x4ce   : > { %s2088_s12 = smov 256  }
 0x4cf   : > { %1855 = dma.vmem_to_hbm [thread:$0]  (%p2169_p11), %s1554_s13, 512, %s1556_s15, %s1541_s22, %s2088_s12, %s2088_s12, %s2083_s11  }
 0x4d0 PF: > { %s1570_s25 = sand.u32 1, %s2057_s18   ;;  %p2648_p7 = scmp.ge.s32.totalorder %s2069_s21, 2 }
 0x4d1   : > { %s1571_s7 = scalar_lea.sflag [#allocation6], %s1570_s25 }
 0x4d2   : > { %p1862_p5 = pnand %p2648_p7, %p2173_p12 }
 0x4d4   : > { %p1863_p8 = pneg %p1862_p5 }
 0x4d6   : > { %2052 = dma.done.wait (%p1863_p8), %s1571_s7, 512  }
 0x4d7   : > { %2054 = vsyncadd (%p1863_p8), %s1571_s7, 4294966784  ;;  %p18_p10 = scmp.ge.s32.totalorder %s2144_s24, 4   ;;  %s2649_s18 = smov %s2061_s19 }
 0x4d8   : > { %s2650_s19 = smov %s2065_s20  ;;  %s2651_s20 = smov %s2156_s27 }
 0x4d9   : > { %s2652_s21 = smov %s2144_s24  ;;  %20 = sbr.rel (!%p18_p10) target bundleno = 5 (0x5), region = 85 }
 0x4de   :  { %1577 = vsyncpa [#allocation5], 1 }
 0x4df   :  { %1579 = vsyncpa [#allocation5 + $0x1], 1 }
 0x4e0   :  { %1580 = vsyncpa [#allocation6], 1 }
 0x4e1   :  { %1582 = vsyncpa [#allocation6 + $0x1], 1 }

</bundles_post_ra>
